<compile_context>
chip_gen: v7x
topology: tpu7x:2x2x1
jax: 0.10.0
libtpu: 0.0.40
codegen_flags: <defaults>
</compile_context>

<pallas_src>
import numpy as np
import jax
import jax.numpy as jnp
from jax import lax
from jax.experimental import pallas as pl
from jax.experimental.pallas import tpu as pltpu


# ----------------------------------------------------------------------------
# Mask construction (faithful port of MaskedConvolution2D.__init__ mask logic)
# ----------------------------------------------------------------------------
def build_pixelrnn_mask(c_out, c_in, kh, kw, mask_type="B"):
    for d in (kh, kw):
        if d % 2 == 0:
            raise ValueError("This layer only works if all kernel sizes are odd numbers.")
    mask = np.ones((c_out, c_in, kh, kw), dtype=np.float32)
    cy, cx = kh // 2, kw // 2
    mask[:, :, cy + 1:, :] = 0
    mask[:, :, :, cx + 1:] = 0
    if mask_type == "A":
        if c_in // 3:
            cinc = c_in // 3
            coutc = c_out // 3
            mask[:, :, cy, cx] = 0
            mask[coutc:coutc * 2, :cinc, cy, cx] = 1
            mask[coutc * 2:coutc * 3, :cinc * 2, cy, cx] = 1
        if c_in == 1:
            mask[:, :, cy, cx] = 0
    elif c_in // 3:
        cinc = c_in // 3
        coutc = c_out // 3
        mask[:, :, cy, cx] = 0
        mask[:coutc, :cinc, cy, cx] = 1
        mask[coutc:coutc * 2, :cinc * 2, cy, cx] = 1
        mask[coutc * 2:coutc * 3, :, cy, cx] = 1
    return mask


def _round_up(x, m):
    return ((x + m - 1) // m) * m


# ----------------------------------------------------------------------------
# Wrapper + kernel.  One grid step == one batch element:
#   x_ref     : (1, Hp, Wp, C_in)   zero-padded NHWC image (VMEM, auto-DMA)
#   w_ref     : (C_pad, K)          masked weights, rows = output channels,
#                                   cols = (ky*KW + kx)*C_in + c
#   b_ref     : (C_pad, 1)          bias
#   o_ref     : (1, C_pad, M)       (C, M) layout -> lane-dense stores,
#                                   reshape-only NCHW recovery in the wrapper
#   patch_ref : (M, K) f32 VMEM scratch, filled by in-kernel im2col
# ----------------------------------------------------------------------------
def masked_conv2d(x_nchw, weight_oihw, bias, mask_oihw, *, stride=1, padding=0):
    w_masked = weight_oihw * mask_oihw                      # forward re-masks weights
    n, c_in, h, w_sp = x_nchw.shape
    c_out, _, kh, kw = w_masked.shape
    h_out = (h + 2 * padding - kh) // stride + 1
    w_out = (w_sp + 2 * padding - kw) // stride + 1
    m = h_out * w_out                                       # 256 here (2x128 lanes)
    k_dim = kh * kw * c_in                                  # 36; not padded in HBM
    c_pad = _round_up(c_out, 8)                             # sublane-friendly rows
    hp, wp = h + 2 * padding, w_sp + 2 * padding

    # --- layout plumbing only: one cheap pass over the small input ----------
    # TODO(synk): at production H/W/C fold the pad + halo extraction into
    # manual in-kernel DMA over an M-row grid axis instead of jnp.pad here.
    x_nhwc = jnp.transpose(x_nchw, (0, 2, 3, 1))
    xpad = jnp.pad(x_nhwc, ((0, 0), (padding, padding), (padding, padding), (0, 0)))

    # Weight columns match the in-kernel tap order: (ky*KW + kx)*C_in + c
    w_mat = jnp.transpose(w_masked, (0, 2, 3, 1)).reshape(c_out, k_dim)
    w_mat = jnp.pad(w_mat, ((0, c_pad - c_out), (0, 0)))
    b_mat = jnp.pad(bias, (0, c_pad - c_out)).reshape(c_pad, 1)

    def kernel(x_ref, w_ref, b_ref, o_ref, patch_ref):
        # ---- in-kernel im2col: fill the (M, K) patch scratch ----------------
        for ky in range(kh):
            for kx in range(kw):
                t = ky * kw + kx
                if stride == 1:
                    win = x_ref[0, ky:ky + h_out, kx:kx + w_out, :]
                else:
                    win = x_ref[0, pl.ds(ky, h_out, stride),
                                   pl.ds(kx, w_out, stride), :]
                # (h_out, w_out, c_in) -> (M, c_in): leading-dim collapse only
                patch_ref[:, t * c_in:(t + 1) * c_in] = win.reshape(m, c_in)

        # ---- single MXU matmul, f32 accumulation: (C_pad,K) . (M,K)^T ------
        acc = lax.dot_general(
            w_ref[...], patch_ref[...],
            dimension_numbers=(((1,), (1,)), ((), ())),
            preferred_element_type=jnp.float32)             # (C_pad, M)
        o_ref[0] = (acc + b_ref[...]).astype(o_ref.dtype)   # bias added once

    out = pl.pallas_call(
        kernel,
        out_shape=jax.ShapeDtypeStruct((n, c_pad, m), x_nchw.dtype),
        grid=(n,),
        in_specs=[
            pl.BlockSpec((1, hp, wp, c_in), lambda i: (i, 0, 0, 0)),
            pl.BlockSpec((c_pad, k_dim), lambda i: (0, 0)),   # resident weights
            pl.BlockSpec((c_pad, 1), lambda i: (0, 0)),       # resident bias
        ],
        out_specs=pl.BlockSpec((1, c_pad, m), lambda i: (i, 0, 0)),
        scratch_shapes=[pltpu.VMEM((m, k_dim), x_nchw.dtype)],
        compiler_params=pltpu.CompilerParams(
            dimension_semantics=("parallel",),   # N>=2 keeps both v7x TCs busy
            vmem_limit_bytes=32 * 1024 * 1024,   # safe on v7x's smaller VMEM
        ),
    )(xpad, w_mat, b_mat)

    # (N, C_pad, M) -> NCHW: slice (no-op when c_pad == c_out) + pure reshape
    return out[:, :c_out, :].reshape(n, c_out, h_out, w_out)


if __name__ == "__main__":
    # Small config consistent with the PyTorch module
    N, C_IN, H, W = 2, 4, 16, 16
    C_OUT, K, STRIDE, PADDING = 8, 3, 1, 1
    MASK_TYPE = "B"

    key = jax.random.PRNGKey(0)
    kx_, kw_, kb_ = jax.random.split(key, 3)

    x = jax.random.normal(kx_, (N, C_IN, H, W), dtype=jnp.float32)

    # Deterministic Conv2d-style init: uniform(-bound, bound), bound = 1/sqrt(fan_in)
    fan_in = C_IN * K * K
    bound = 1.0 / np.sqrt(fan_in)
    weight = jax.random.uniform(kw_, (C_OUT, C_IN, K, K), jnp.float32, -bound, bound)
    bias = jax.random.uniform(kb_, (C_OUT,), jnp.float32, -bound, bound)

    mask = jnp.asarray(build_pixelrnn_mask(C_OUT, C_IN, K, K, MASK_TYPE))

    out = masked_conv2d(x, weight, bias, mask, stride=STRIDE, padding=PADDING)
    out = jax.block_until_ready(out)

    # Pure-JAX reference (same masked-conv semantics as the PyTorch module)
    ref = lax.conv_general_dilated(
        x, weight * mask, (STRIDE, STRIDE), [(PADDING, PADDING)] * 2,
        dimension_numbers=("NCHW", "OIHW", "NCHW"),
    ) + bias[None, :, None, None]

    np.testing.assert_allclose(np.asarray(out), np.asarray(ref), rtol=1e-5, atol=1e-5)
    print("KERNEL_OK")
</pallas_src>

<mosaic_0001>
module attributes {stable_mosaic.version = 11 : i64} {
  func.func @kernel(%arg0: i32, %arg1: memref<1x18x18x4xf32, #tpu.memory_space<vmem>>, %arg2: memref<8x36xf32, #tpu.memory_space<vmem>>, %arg3: memref<8x1xf32, #tpu.memory_space<vmem>>, %arg4: memref<1x8x256xf32, #tpu.memory_space<vmem>>, %arg5: memref<256x36xf32, #tpu.memory_space<vmem>>) attributes {dimension_semantics = [#tpu.dimension_semantics<parallel>], iteration_bounds = array<i64: 2>, scalar_prefetch = 0 : i64, scratch_operands = 1 : i64, tpu.core_type = #tpu.core_type<tc>, window_params = [{transform_indices = @transform_0, window_bounds = array<i64: 1, 18, 18, 4>}, {pipeline_mode = #tpu.pipeline_mode<synchronous>, transform_indices = @transform_1, window_bounds = array<i64: 8, 36>}, {pipeline_mode = #tpu.pipeline_mode<synchronous>, transform_indices = @transform_2, window_bounds = array<i64: 8, 1>}, {transform_indices = @transform_3, window_bounds = array<i64: 1, 8, 256>}]} {
    %c0 = arith.constant 0 : index
    %c0_0 = arith.constant 0 : index
    %c0_1 = arith.constant 0 : index
    %c0_2 = arith.constant 0 : index
    %0 = vector.load %arg1[%c0, %c0_0, %c0_1, %c0_2] : memref<1x18x18x4xf32, #tpu.memory_space<vmem>>, vector<1x16x16x4xf32>
    %1 = vector.shape_cast %0 : vector<1x16x16x4xf32> to vector<16x16x4xf32>
    %2 = vector.shape_cast %1 : vector<16x16x4xf32> to vector<256x4xf32>
    %c0_3 = arith.constant 0 : index
    %c0_4 = arith.constant 0 : index
    %3 = vector.load %arg5[%c0_3, %c0_4] : memref<256x36xf32, #tpu.memory_space<vmem>>, vector<256x4xf32>
    tpu.vector_store %arg5[%c0_3, %c0_4], %2 {strides = array<i32>} : memref<256x36xf32, #tpu.memory_space<vmem>>, vector<256x4xf32>,
    %c0_5 = arith.constant 0 : index
    %c0_6 = arith.constant 0 : index
    %c1 = arith.constant 1 : index
    %c0_7 = arith.constant 0 : index
    %4 = vector.load %arg1[%c0_5, %c0_6, %c1, %c0_7] : memref<1x18x18x4xf32, #tpu.memory_space<vmem>>, vector<1x16x16x4xf32>
    %5 = vector.shape_cast %4 : vector<1x16x16x4xf32> to vector<16x16x4xf32>
    %6 = vector.shape_cast %5 : vector<16x16x4xf32> to vector<256x4xf32>
    %c0_8 = arith.constant 0 : index
    %c4 = arith.constant 4 : index
    %7 = vector.load %arg5[%c0_8, %c4] : memref<256x36xf32, #tpu.memory_space<vmem>>, vector<256x4xf32>
    tpu.vector_store %arg5[%c0_8, %c4], %6 {strides = array<i32>} : memref<256x36xf32, #tpu.memory_space<vmem>>, vector<256x4xf32>,
    %c0_9 = arith.constant 0 : index
    %c0_10 = arith.constant 0 : index
    %c2 = arith.constant 2 : index
    %c0_11 = arith.constant 0 : index
    %8 = vector.load %arg1[%c0_9, %c0_10, %c2, %c0_11] : memref<1x18x18x4xf32, #tpu.memory_space<vmem>>, vector<1x16x16x4xf32>
    %9 = vector.shape_cast %8 : vector<1x16x16x4xf32> to vector<16x16x4xf32>
    %10 = vector.shape_cast %9 : vector<16x16x4xf32> to vector<256x4xf32>
    %c0_12 = arith.constant 0 : index
    %c8 = arith.constant 8 : index
    %11 = vector.load %arg5[%c0_12, %c8] : memref<256x36xf32, #tpu.memory_space<vmem>>, vector<256x4xf32>
    tpu.vector_store %arg5[%c0_12, %c8], %10 {strides = array<i32>} : memref<256x36xf32, #tpu.memory_space<vmem>>, vector<256x4xf32>,
    %c0_13 = arith.constant 0 : index
    %c1_14 = arith.constant 1 : index
    %c0_15 = arith.constant 0 : index
    %c0_16 = arith.constant 0 : index
    %12 = vector.load %arg1[%c0_13, %c1_14, %c0_15, %c0_16] : memref<1x18x18x4xf32, #tpu.memory_space<vmem>>, vector<1x16x16x4xf32>
    %13 = vector.shape_cast %12 : vector<1x16x16x4xf32> to vector<16x16x4xf32>
    %14 = vector.shape_cast %13 : vector<16x16x4xf32> to vector<256x4xf32>
    %c0_17 = arith.constant 0 : index
    %c12 = arith.constant 12 : index
    %15 = vector.load %arg5[%c0_17, %c12] : memref<256x36xf32, #tpu.memory_space<vmem>>, vector<256x4xf32>
    tpu.vector_store %arg5[%c0_17, %c12], %14 {strides = array<i32>} : memref<256x36xf32, #tpu.memory_space<vmem>>, vector<256x4xf32>,
    %c0_18 = arith.constant 0 : index
    %c1_19 = arith.constant 1 : index
    %c1_20 = arith.constant 1 : index
    %c0_21 = arith.constant 0 : index
    %16 = vector.load %arg1[%c0_18, %c1_19, %c1_20, %c0_21] : memref<1x18x18x4xf32, #tpu.memory_space<vmem>>, vector<1x16x16x4xf32>
    %17 = vector.shape_cast %16 : vector<1x16x16x4xf32> to vector<16x16x4xf32>
    %18 = vector.shape_cast %17 : vector<16x16x4xf32> to vector<256x4xf32>
    %c0_22 = arith.constant 0 : index
    %c16 = arith.constant 16 : index
    %19 = vector.load %arg5[%c0_22, %c16] : memref<256x36xf32, #tpu.memory_space<vmem>>, vector<256x4xf32>
    tpu.vector_store %arg5[%c0_22, %c16], %18 {strides = array<i32>} : memref<256x36xf32, #tpu.memory_space<vmem>>, vector<256x4xf32>,
    %c0_23 = arith.constant 0 : index
    %c1_24 = arith.constant 1 : index
    %c2_25 = arith.constant 2 : index
    %c0_26 = arith.constant 0 : index
    %20 = vector.load %arg1[%c0_23, %c1_24, %c2_25, %c0_26] : memref<1x18x18x4xf32, #tpu.memory_space<vmem>>, vector<1x16x16x4xf32>
    %21 = vector.shape_cast %20 : vector<1x16x16x4xf32> to vector<16x16x4xf32>
    %22 = vector.shape_cast %21 : vector<16x16x4xf32> to vector<256x4xf32>
    %c0_27 = arith.constant 0 : index
    %c20 = arith.constant 20 : index
    %23 = vector.load %arg5[%c0_27, %c20] : memref<256x36xf32, #tpu.memory_space<vmem>>, vector<256x4xf32>
    tpu.vector_store %arg5[%c0_27, %c20], %22 {strides = array<i32>} : memref<256x36xf32, #tpu.memory_space<vmem>>, vector<256x4xf32>,
    %c0_28 = arith.constant 0 : index
    %c2_29 = arith.constant 2 : index
    %c0_30 = arith.constant 0 : index
    %c0_31 = arith.constant 0 : index
    %24 = vector.load %arg1[%c0_28, %c2_29, %c0_30, %c0_31] : memref<1x18x18x4xf32, #tpu.memory_space<vmem>>, vector<1x16x16x4xf32>
    %25 = vector.shape_cast %24 : vector<1x16x16x4xf32> to vector<16x16x4xf32>
    %26 = vector.shape_cast %25 : vector<16x16x4xf32> to vector<256x4xf32>
    %c0_32 = arith.constant 0 : index
    %c24 = arith.constant 24 : index
    %27 = vector.load %arg5[%c0_32, %c24] : memref<256x36xf32, #tpu.memory_space<vmem>>, vector<256x4xf32>
    tpu.vector_store %arg5[%c0_32, %c24], %26 {strides = array<i32>} : memref<256x36xf32, #tpu.memory_space<vmem>>, vector<256x4xf32>,
    %c0_33 = arith.constant 0 : index
    %c2_34 = arith.constant 2 : index
    %c1_35 = arith.constant 1 : index
    %c0_36 = arith.constant 0 : index
    %28 = vector.load %arg1[%c0_33, %c2_34, %c1_35, %c0_36] : memref<1x18x18x4xf32, #tpu.memory_space<vmem>>, vector<1x16x16x4xf32>
    %29 = vector.shape_cast %28 : vector<1x16x16x4xf32> to vector<16x16x4xf32>
    %30 = vector.shape_cast %29 : vector<16x16x4xf32> to vector<256x4xf32>
    %c0_37 = arith.constant 0 : index
    %c28 = arith.constant 28 : index
    %31 = vector.load %arg5[%c0_37, %c28] : memref<256x36xf32, #tpu.memory_space<vmem>>, vector<256x4xf32>
    tpu.vector_store %arg5[%c0_37, %c28], %30 {strides = array<i32>} : memref<256x36xf32, #tpu.memory_space<vmem>>, vector<256x4xf32>,
    %c0_38 = arith.constant 0 : index
    %c2_39 = arith.constant 2 : index
    %c2_40 = arith.constant 2 : index
    %c0_41 = arith.constant 0 : index
    %32 = vector.load %arg1[%c0_38, %c2_39, %c2_40, %c0_41] : memref<1x18x18x4xf32, #tpu.memory_space<vmem>>, vector<1x16x16x4xf32>
    %33 = vector.shape_cast %32 : vector<1x16x16x4xf32> to vector<16x16x4xf32>
    %34 = vector.shape_cast %33 : vector<16x16x4xf32> to vector<256x4xf32>
    %c0_42 = arith.constant 0 : index
    %c32 = arith.constant 32 : index
    %35 = vector.load %arg5[%c0_42, %c32] : memref<256x36xf32, #tpu.memory_space<vmem>>, vector<256x4xf32>
    tpu.vector_store %arg5[%c0_42, %c32], %34 {strides = array<i32>} : memref<256x36xf32, #tpu.memory_space<vmem>>, vector<256x4xf32>,
    %c0_43 = arith.constant 0 : index
    %c0_44 = arith.constant 0 : index
    %36 = vector.load %arg2[%c0_43, %c0_44] : memref<8x36xf32, #tpu.memory_space<vmem>>, vector<8x36xf32>
    %c0_45 = arith.constant 0 : index
    %c0_46 = arith.constant 0 : index
    %37 = vector.load %arg5[%c0_45, %c0_46] : memref<256x36xf32, #tpu.memory_space<vmem>>, vector<256x36xf32>
    %cst = arith.constant dense<0.000000e+00> : vector<8x256xf32>
    %38 = tpu.matmul %36, %37, %cst {dimension_numbers = #tpu.dot_dimension_numbers<[1], [1], [0], [0], [0, 0, 1, 0], [], []>} : vector<8x36xf32>, vector<256x36xf32>, vector<8x256xf32> -> vector<8x256xf32>
    %c0_47 = arith.constant 0 : index
    %c0_48 = arith.constant 0 : index
    %39 = vector.load %arg3[%c0_47, %c0_48] : memref<8x1xf32, #tpu.memory_space<vmem>>, vector<8x1xf32>
    %40 = vector.broadcast %39 : vector<8x1xf32> to vector<8x256xf32>
    %41 = arith.addf %38, %40 : vector<8x256xf32>
    %c0_49 = arith.constant 0 : index
    %c0_50 = arith.constant 0 : index
    %c0_51 = arith.constant 0 : index
    %42 = vector.load %arg4[%c0_49, %c0_50, %c0_51] : memref<1x8x256xf32, #tpu.memory_space<vmem>>, vector<1x8x256xf32>
    %43 = vector.shape_cast %42 : vector<1x8x256xf32> to vector<8x256xf32>
    %44 = vector.shape_cast %41 : vector<8x256xf32> to vector<1x8x256xf32>
    tpu.vector_store %arg4[%c0_49, %c0_50, %c0_51], %44 {strides = array<i32>} : memref<1x8x256xf32, #tpu.memory_space<vmem>>, vector<1x8x256xf32>,
    return
  }
  func.func @transform_0(%arg0: i32) -> (i32, i32, i32, i32) {
    %c0_i32 = arith.constant 0 : i32
    %c0_i32_0 = arith.constant 0 : i32
    %c0_i32_1 = arith.constant 0 : i32
    %c0_i32_2 = arith.constant 0 : i32
    return %arg0, %c0_i32, %c0_i32_0, %c0_i32_1 : i32, i32, i32, i32
  }
  func.func @transform_1(%arg0: i32) -> (i32, i32) {
    %c0_i32 = arith.constant 0 : i32
    %c0_i32_0 = arith.constant 0 : i32
    %c0_i32_1 = arith.constant 0 : i32
    return %c0_i32, %c0_i32_0 : i32, i32
  }
  func.func @transform_2(%arg0: i32) -> (i32, i32) {
    %c0_i32 = arith.constant 0 : i32
    %c0_i32_0 = arith.constant 0 : i32
    %c0_i32_1 = arith.constant 0 : i32
    return %c0_i32, %c0_i32_0 : i32, i32
  }
  func.func @transform_3(%arg0: i32) -> (i32, i32, i32) {
    %c0_i32 = arith.constant 0 : i32
    %c0_i32_0 = arith.constant 0 : i32
    %c0_i32_1 = arith.constant 0 : i32
    return %arg0, %c0_i32, %c0_i32_0 : i32, i32, i32
  }
}

</mosaic_0001>

<bundles_post_ra>
// kernel: tpu_custom_call.1
= control target key start
LH: loop header
LB: loop body
LE: loop exit
PB: predicated region body
PF: predicated region fallthrough
CT: control target
= control target key end

     0   :  { %8 = vsyncpa [#allocation4], 0  ;;  %s3673_s0 = inlined_call_operand.vmem [shape: f32[2,18,18,4], index: 0, kind: input, shape index: {}]   ;;  %s3674_s1 = inlined_call_operand.vmem [shape: f32[8,36], index: 1, kind: input, shape index: {}]   ;;  %s3675_s2 = inlined_call_operand.vmem [shape: f32[8,1], index: 2, kind: input, shape index: {}]   ;;  %s3676_s3 = inlined_call_operand.hbm [shape: f32[2,8,256], index: 3, kind: output, shape index: {}]  }
   0x1   :  { %10 = vsyncpa [#allocation4 + $0x1], 0  ;;  %s2529_s12 = smov 0   ;;  %s2531_s13 = smov 0  }
   0x2   :  { %s2533_s14 = smov 0   ;;  %s2535_s15 = smov 0  }
   0x3 LB: > { %s2550_s16 = sadd.s32 4294967295, %s2497_s15   ;;  %s2066_s17 = sadd.s32 4294967294, %s2497_s15   ;;  %s2497_s15 = sphi %s2535_s15, %s3717_s15   ;;  %s2493_s14 = sphi %s2533_s14, %s3716_s14   ;;  %s2489_s13 = sphi %s2531_s13, %s3715_s13   ;;  %s2485_s12 = sphi %s2529_s12, %s3714_s12  }
   0x4   : > { %s2554_s18 = sadd.s32 1, %s2497_s15   ;;  %s91_s19 = sadd.s32 1, %s2493_s14 }
   0x5   : > { %s88_s20 = ssub.s32 %s2497_s15, %s2554_s18  ;;  %p101_p0 = scmp.ne.s32.totalorder %s2493_s14, %s2489_s13 }
   0x6   : > { %p89_p1 = scmp.eq.s32.totalorder %s88_s20, 0  ;;  %p102_p2 = scmp.eq.s32.totalorder %s2550_s16, 1 }
   0x7   : > { %p107_p3 = scmp.ne.s32.totalorder %s2489_s13, %s2485_s12  ;;  %p108_p4 = scmp.eq.s32.totalorder %s2066_s17, 1 }
   0x8   : > { %s2565_s21 = scalar_select %p89_p1, %s2493_s14, %s91_s19  }
   0x9   : > { %p2567_p5 = por %p102_p2, %p101_p0  ;;  %p2571_p6 = por %p108_p4, %p107_p3 }
   0xa   : > { %p2069_p7 = scmp.ge.s32.totalorder %s2497_s15, 1  ;;  %p140_p8 = scmp.lt.s32.totalorder %s2497_s15, 3 }
   0xc   : > { %p141_p9 = pnand %p2069_p7, %p140_p8 }
   0xe   : > { %144 = sbr.rel (%p141_p9) target bundleno = 898 (0x382), region = 32 }
  0x15   : > { %p164_p10 = scmp.lt.s32.totalorder %s2550_s16, 1  ;;  %s2499_s29 = smov 4   ;;  %vm201_vm0 = vcmask 31744   ;;  %vm394_vm1 = vcmask 64544   ;;  %vm587_vm2 = vcmask 97344   ;;  %vm781_vm3 = vcmask 130144  }
  0x16   : > { %s2500_s30 = smov 8   ;;  %s2501_s4 = smov 12   ;;  %vm974_vm4 = vcmask 162944   ;;  %vm1167_vm5 = vcmask 195744   ;;  %vm1361_vm6 = vcmask 228544   ;;  %vm1554_vm7 = vcmask 261344  }
  0x17   : > { %s165_s24 = scalar_select %p164_p10, %s2550_s16, 1  ;;  %vm1747_vm8 = vcmask 294144   ;;  %vm1819_vm9 = vcmask 293888  }
  0x18   : > { %s2502_s5 = smov 16   ;;  %s2503_s6 = smov 20   ;;  %vm3266_vm10 = vmpackc.low %vm1819_vm9, %vm1819_vm9 }
  0x19   : > { %s2385_s25 = smul.u32 432, %s165_s24  ;;  %s2504_s7 = smov 24  }
  0x1a   : > { %s2505_s8 = smov 28   ;;  %s2506_s9 = smov 32  }
  0x1b   : > { %s2582_s28 = scalar_lea.vmem %s3673_s0, %s2385_s25  ;;  %s161_s20 = sand.u32 1, %s2489_s13  }
  0x1c   : > { %v2585_v0 = vld [vmem:[%s2582_s28 + $0x19] sm:$0xff]  ;;  %v234_v1 = vld [vmem:[%s2582_s28 + $0x1] sm:$0xff]  ;;  %v235_v3 = vld [vmem:[%s2582_s28 + $0x9] sm:$0xff]  ;;  %s2070_s24 = sshll.u32 %s161_s20, 4  ;;  %s2302_s25 = sshll.u32 %s2550_s16, 8 }
  0x1d   : > { %302 = vrot.lane.b32.xlu1 %v2585_v0, %s2499_s29  ;;  %298 = vrot.lane.b32.xlu0 %v234_v1, %s2499_s29  ;;  %v2592_v2 = vld [vmem:[%s2582_s28 + $0x21] sm:$0xff]  ;;  %v2599_v4 = vld [vmem:[%s2582_s28 + $0x39] sm:$0xff]  ;;  %s163_s26 = scalar_lea.vmem [#allocation3], %s2070_s24 }
  0x1e   : > { %v2602_v5 = vld [vmem:[%s2582_s28 + $0x31] sm:$0xff]  ;;  %v2612_v7 = vld [vmem:[%s2582_s28 + $0x49] sm:$0xff]  ;;  %v2622_v9 = vld [vmem:[%s2582_s28 + $0x61] sm:$0xff]  ;;  %s2007_s27 = sshll.u32 %s163_s26, 4  ;;  %s3633_s27 = int_to_ptr.vmem [resolvable:$true] %s2007_s27 }
  0x1f   : > { %v2609_v6 = vld [vmem:[%s2582_s28 + $0x51] sm:$0xff]  ;;  %v2619_v8 = vld [vmem:[%s2582_s28 + $0x69] sm:$0xff]  ;;  %v245_v10 = vld [vmem:[%s2582_s28 + $0x81] sm:$0xff]  ;;  %s2435_s16 = scalar_lea.vmem %s3633_s27, 256 }
  0x20   : > { %v244_v11 = vld [vmem:[%s2582_s28 + $0x79] sm:$0xff]  ;;  %v246_v15 = vld [vmem:[%s2582_s28 + $0x91] sm:$0xff]  ;;  %v170_v17 = vld [vmem:[%s2582_s28 + $0x8] sm:$0xff]  ;;  %p2436_p11 = scmp.ne.s32.totalorder %s3633_s27, %s2435_s16 }
  0x21   : > { %304 = vrot.lane.b32.xlu1 %v2592_v2, %s2499_s29  ;;  %300 = vrot.lane.b32.xlu0 %v235_v3, %s2499_s29  ;;  %v2633_v12 = vld [vmem:[%s2582_s28 + $0x18] sm:$0xff]  ;;  %v169_v13 = vld [vmem:[%s2582_s28] sm:$0xff]  ;;  %203 = vst.msk [vmem:[#allocation2 + $0x8] sm:$0xff] %vm201_vm0, %v170_v17 }
  0x22   : > { %v247_v14 = vld [vmem:[%s2582_s28 + $0x99] sm:$0xff]  ;;  %204 = vst.msk [vmem:[#allocation2 + $0x10] sm:$0xff] %vm201_vm0, %v2633_v12  ;;  %202 = vst.msk [vmem:[#allocation2] sm:$0xff] %vm201_vm0, %v169_v13  ;;  %v249_v18 = vld [vmem:[%s2582_s28 + $0xb1] sm:$0xff]  ;;  %p2437_p12 = pnand %p2436_p11, %p2567_p5 }
  0x23   : > { %v2642_v16 = vld [vmem:[%s2582_s28 + $0x20] sm:$0xff]  ;;  %v2650_v19 = vld [vmem:[%s2582_s28 + $0x38] sm:$0xff]  ;;  %v2653_v20 = vld [vmem:[%s2582_s28 + $0x30] sm:$0xff] }
  0x24   : > { %205 = vst.msk [vmem:[#allocation2 + $0x18] sm:$0xff] %vm201_vm0, %v2642_v16  ;;  %v248_v21 = vld [vmem:[%s2582_s28 + $0xa9] sm:$0xff]  ;;  %207 = vst.msk [vmem:[#allocation2 + $0x28] sm:$0xff] %vm201_vm0, %v2650_v19  ;;  %v2674_v25 = vld [vmem:[%s2582_s28 + $0x60] sm:$0xff]  ;;  %p2438_p13 = pneg %p2437_p12 }
  0x25   : > { %308 = vrot.lane.b32.xlu1 %v2599_v4, %s2499_s29  ;;  %306 = vrot.lane.b32.xlu0 %v2602_v5, %s2499_s29  ;;  %206 = vst.msk [vmem:[#allocation2 + $0x20] sm:$0xff] %vm201_vm0, %v2653_v20  ;;  %v2663_v22 = vld [vmem:[%s2582_s28 + $0x50] sm:$0xff]  ;;  %v2668_v23 = vld [vmem:[%s2582_s28 + $0x48] sm:$0xff]  ;;  %210 = vst.msk [vmem:[#allocation2 + $0x40] sm:$0xff] %vm201_vm0, %v2674_v25 }
  0x26   : > { %209 = vst.msk [vmem:[#allocation2 + $0x38] sm:$0xff] %vm201_vm0, %v2663_v22  ;;  %v2671_v24 = vld [vmem:[%s2582_s28 + $0x68] sm:$0xff]  ;;  %208 = vst.msk [vmem:[#allocation2 + $0x30] sm:$0xff] %vm201_vm0, %v2668_v23  ;;  %v2683_v26 = vld [vmem:[%s2582_s28 + $0x80] sm:$0xff] }
  0x27   : > { %211 = vst.msk [vmem:[#allocation2 + $0x48] sm:$0xff] %vm201_vm0, %v2671_v24  ;;  %v2686_v27 = vld [vmem:[%s2582_s28 + $0x78] sm:$0xff]  ;;  %v251_v29 = vld [vmem:[%s2582_s28 + $0xc9] sm:$0xff]  ;;  %v250_v30 = vld [vmem:[%s2582_s28 + $0xc1] sm:$0xff] }
  0x28   : > { %v2689_v28 = vld [vmem:[%s2582_s28 + $0x98] sm:$0xff]  ;;  %213 = vst.msk [vmem:[#allocation2 + $0x58] sm:$0xff] %vm201_vm0, %v2683_v26  ;;  %212 = vst.msk [vmem:[#allocation2 + $0x50] sm:$0xff] %vm201_vm0, %v2686_v27  ;;  %v2700_v31 = vld [vmem:[%s2582_s28 + $0x90] sm:$0xff] }
  0x29   : > { %312 = vrot.lane.b32.xlu1 %v2609_v6, %s2499_s29  ;;  %310 = vrot.lane.b32.xlu0 %v2612_v7, %s2499_s29  ;;  %215 = vst.msk [vmem:[#allocation2 + $0x68] sm:$0xff] %vm201_vm0, %v2689_v28  ;;  %v2703_v32 = vld [vmem:[%s2582_s28 + $0xb0] sm:$0xff]  ;;  %v2706_v33 = vld [vmem:[%s2582_s28 + $0xa8] sm:$0xff]  ;;  %214 = vst.msk [vmem:[#allocation2 + $0x60] sm:$0xff] %vm201_vm0, %v2700_v31 }
  0x2a   : > { %217 = vst.msk [vmem:[#allocation2 + $0x78] sm:$0xff] %vm201_vm0, %v2703_v32  ;;  %216 = vst.msk [vmem:[#allocation2 + $0x70] sm:$0xff] %vm201_vm0, %v2706_v33  ;;  %v2717_v34 = vld [vmem:[%s2582_s28 + $0xc8] sm:$0xff]  ;;  %v2720_v35 = vld [vmem:[%s2582_s28 + $0xc0] sm:$0xff] }
  0x2b   : > { %219 = vst.msk [vmem:[#allocation2 + $0x88] sm:$0xff] %vm201_vm0, %v2717_v34  ;;  %218 = vst.msk [vmem:[#allocation2 + $0x80] sm:$0xff] %vm201_vm0, %v2720_v35  ;;  %v2727_v36 = vld [vmem:[%s2582_s28 + $0xe0] sm:$0xff]  ;;  %v2730_v37 = vld [vmem:[%s2582_s28 + $0xd8] sm:$0xff] }
  0x2c   : > { %v2733_v38 = vld [vmem:[%s2582_s28 + $0xf8] sm:$0xff]  ;;  %221 = vst.msk [vmem:[#allocation2 + $0x98] sm:$0xff] %vm201_vm0, %v2727_v36  ;;  %220 = vst.msk [vmem:[#allocation2 + $0x90] sm:$0xff] %vm201_vm0, %v2730_v37  ;;  %v2742_v39 = vld [vmem:[%s2582_s28 + $0xf0] sm:$0xff] }
  0x2d   : > { %316 = vrot.lane.b32.xlu1 %v2619_v8, %s2499_s29  ;;  %314 = vrot.lane.b32.xlu0 %v2622_v9, %s2499_s29  ;;  %223 = vst.msk [vmem:[#allocation2 + $0xa8] sm:$0xff] %vm201_vm0, %v2733_v38  ;;  %v2745_v40 = vld [vmem:[%s2582_s28 + $0x110] sm:$0xff]  ;;  %v2748_v41 = vld [vmem:[%s2582_s28 + $0x108] sm:$0xff]  ;;  %222 = vst.msk [vmem:[#allocation2 + $0xa0] sm:$0xff] %vm201_vm0, %v2742_v39 }
  0x2e   : > { %225 = vst.msk [vmem:[#allocation2 + $0xb8] sm:$0xff] %vm201_vm0, %v2745_v40  ;;  %224 = vst.msk [vmem:[#allocation2 + $0xb0] sm:$0xff] %vm201_vm0, %v2748_v41  ;;  %v2759_v42 = vld [vmem:[%s2582_s28 + $0xe1] sm:$0xff]  ;;  %v2762_v43 = vld [vmem:[%s2582_s28 + $0xd9] sm:$0xff] }
  0x2f   : > { %v2765_v44 = vld [vmem:[%s2582_s28 + $0x128] sm:$0xff]  ;;  %v2768_v45 = vld [vmem:[%s2582_s28 + $0x120] sm:$0xff]  ;;  %v2782_v47 = vld [vmem:[%s2582_s28 + $0xf1] sm:$0xff] }
  0x30   : > { %227 = vst.msk [vmem:[#allocation2 + $0xc8] sm:$0xff] %vm201_vm0, %v2765_v44  ;;  %226 = vst.msk [vmem:[#allocation2 + $0xc0] sm:$0xff] %vm201_vm0, %v2768_v45  ;;  %v2779_v46 = vld [vmem:[%s2582_s28 + $0xf9] sm:$0xff]  ;;  %v2799_v50 = vld [vmem:[%s2582_s28 + $0x111] sm:$0xff] }
  0x31   : > { %320 = vrot.lane.b32.xlu1 %v245_v10, %s2499_s29  ;;  %318 = vrot.lane.b32.xlu0 %v244_v11, %s2499_s29  ;;  %v2785_v48 = vld [vmem:[%s2582_s28 + $0x140] sm:$0xff]  ;;  %v2788_v49 = vld [vmem:[%s2582_s28 + $0x138] sm:$0xff] }
  0x32   : > { %3694 = vst [vmem:[#allocation6_spill] sm:$0xff] %v2785_v48  ;;  %3695 = vst [vmem:[#allocation7_spill] sm:$0xff] %v2788_v49  ;;  %v2802_v51 = vld [vmem:[%s2582_s28 + $0x109] sm:$0xff]  ;;  %v2805_v52 = vld [vmem:[%s2582_s28 + $0x158] sm:$0xff] }
  0x33   : > { %229 = vst.msk [vmem:[#allocation2 + $0xd8] sm:$0xff] %vm201_vm0, %v2785_v48  ;;  %228 = vst.msk [vmem:[#allocation2 + $0xd0] sm:$0xff] %vm201_vm0, %v2788_v49  ;;  %v2808_v53 = vld [vmem:[%s2582_s28 + $0x150] sm:$0xff]  ;;  %v2822_v55 = vld [vmem:[%s2582_s28 + $0x121] sm:$0xff] }
  0x34   : > { %3696 = vst [vmem:[#allocation8_spill] sm:$0xff] %v2805_v52  ;;  %3697 = vst [vmem:[#allocation9_spill] sm:$0xff] %v2808_v53  ;;  %v2819_v54 = vld [vmem:[%s2582_s28 + $0x129] sm:$0xff]  ;;  %v261_v58 = vld [vmem:[%s2582_s28 + $0x141] sm:$0xff] }
  0x35   : > { %324 = vrot.lane.b32.xlu1 %v247_v14, %s2499_s29  ;;  %322 = vrot.lane.b32.xlu0 %v246_v15, %s2499_s29  ;;  %231 = vst.msk [vmem:[#allocation2 + $0xe8] sm:$0xff] %vm201_vm0, %v2805_v52  ;;  %230 = vst.msk [vmem:[#allocation2 + $0xe0] sm:$0xff] %vm201_vm0, %v2808_v53  ;;  %v2825_v56 = vld [vmem:[%s2582_s28 + $0x170] sm:$0xff]  ;;  %v2828_v57 = vld [vmem:[%s2582_s28 + $0x168] sm:$0xff] }
  0x36   : > { %3698 = vst [vmem:[#allocation10_spill] sm:$0xff] %v2825_v56  ;;  %3699 = vst [vmem:[#allocation11_spill] sm:$0xff] %v2828_v57  ;;  %v260_v59 = vld [vmem:[%s2582_s28 + $0x139] sm:$0xff]  ;;  %v262_v61 = vld [vmem:[%s2582_s28 + $0x151] sm:$0xff] }
  0x37   : > { %233 = vst.msk [vmem:[#allocation2 + $0xf8] sm:$0xff] %vm201_vm0, %v2825_v56  ;;  %232 = vst.msk [vmem:[#allocation2 + $0xf0] sm:$0xff] %vm201_vm0, %v2828_v57  ;;  %v263_v60 = vld [vmem:[%s2582_s28 + $0x159] sm:$0xff]  ;;  %v265_v62 = vld [vmem:[%s2582_s28 + $0x171] sm:$0xff] }
  0x38   : > { %v264_v63 = vld [vmem:[%s2582_s28 + $0x169] sm:$0xff]  ;;  %v2858_v11 = vld [vmem:[%s2582_s28 + $0x1a] sm:$0xff]  ;;  %v2868_v14 = vld [vmem:[%s2582_s28 + $0x32] sm:$0xff] }
  0x39   : > { %328 = vrot.lane.b32.xlu1 %v249_v18, %s2499_s29  ;;  %326 = vrot.lane.b32.xlu0 %v248_v21, %s2499_s29  ;;  %v428_v1 = vld [vmem:[%s2582_s28 + $0xa] sm:$0xff]  ;;  %v427_v3 = vld [vmem:[%s2582_s28 + $0x2] sm:$0xff] }
  0x3a   : > { %v2855_v10 = vld [vmem:[%s2582_s28 + $0x22] sm:$0xff]  ;;  %v2865_v13 = vld [vmem:[%s2582_s28 + $0x3a] sm:$0xff]  ;;  %v2875_v15 = vld [vmem:[%s2582_s28 + $0x52] sm:$0xff] }
  0x3b   : > { %v2878_v17 = vld [vmem:[%s2582_s28 + $0x4a] sm:$0xff]  ;;  %v2888_v21 = vld [vmem:[%s2582_s28 + $0x62] sm:$0xff]  ;;  %v456_v53 = vld [vmem:[%s2582_s28 + $0x15a] sm:$0xff] }
  0x3c   : > { %v2885_v18 = vld [vmem:[%s2582_s28 + $0x6a] sm:$0xff]  ;;  %3701 = vst [vmem:[#allocation13_spill] sm:$0xff] %v2888_v21  ;;  %v455_v52 = vld [vmem:[%s2582_s28 + $0x152] sm:$0xff] }
  0x3d   : > { %332 = vrot.lane.b32.xlu1 %v251_v29, %s2499_s29  ;;  %330 = vrot.lane.b32.xlu0 %v250_v30, %s2499_s29  ;;  %3700 = vst [vmem:[#allocation12_spill] sm:$0xff] %v2885_v18  ;;  %v438_v29 = vld [vmem:[%s2582_s28 + $0x82] sm:$0xff]  ;;  %v437_v30 = vld [vmem:[%s2582_s28 + $0x7a] sm:$0xff] }
  0x41   : > { %336 = vrot.lane.b32.xlu1 %v2759_v42, %s2499_s29  ;;  %334 = vrot.lane.b32.xlu0 %v2762_v43, %s2499_s29 }
  0x45   : > { %340 = vrot.lane.b32.xlu1 %v2779_v46, %s2499_s29  ;;  %338 = vrot.lane.b32.xlu0 %v2782_v47, %s2499_s29 }
  0x49   : > { %344 = vrot.lane.b32.xlu1 %v2799_v50, %s2499_s29  ;;  %342 = vrot.lane.b32.xlu0 %v2802_v51, %s2499_s29 }
  0x4d   : > { %348 = vrot.lane.b32.xlu1 %v2819_v54, %s2499_s29  ;;  %346 = vrot.lane.b32.xlu0 %v2822_v55, %s2499_s29 }
  0x51   : > { %352 = vrot.lane.b32.xlu1 %v261_v58, %s2499_s29  ;;  %350 = vrot.lane.b32.xlu0 %v260_v59, %s2499_s29  ;;  %v440_v58 = vld [vmem:[%s2582_s28 + $0x9a] sm:$0xff]  ;;  %v439_v59 = vld [vmem:[%s2582_s28 + $0x92] sm:$0xff] }
  0x55   : > { %356 = vrot.lane.b32.xlu1 %v263_v60, %s2499_s29  ;;  %354 = vrot.lane.b32.xlu0 %v262_v61, %s2499_s29  ;;  %v442_v60 = vld [vmem:[%s2582_s28 + $0xb2] sm:$0xff]  ;;  %v441_v61 = vld [vmem:[%s2582_s28 + $0xaa] sm:$0xff] }
  0x59   : > { %360 = vrot.lane.b32.xlu1 %v265_v62, %s2499_s29  ;;  %358 = vrot.lane.b32.xlu0 %v264_v63, %s2499_s29  ;;  %v444_v62 = vld [vmem:[%s2582_s28 + $0xca] sm:$0xff]  ;;  %v443_v63 = vld [vmem:[%s2582_s28 + $0xc2] sm:$0xff] }
  0x5d   : > { %493 = vrot.lane.b32.xlu1 %v428_v1, %s2500_s30  ;;  %491 = vrot.lane.b32.xlu0 %v427_v3, %s2500_s30  ;;  %v2911_v1 = vld [vmem:[%s2582_s28 + $0xe2] sm:$0xff]  ;;  %v2914_v3 = vld [vmem:[%s2582_s28 + $0xda] sm:$0xff] }
  0x61   : > { %497 = vrot.lane.b32.xlu1 %v2855_v10, %s2500_s30  ;;  %495 = vrot.lane.b32.xlu0 %v2858_v11, %s2500_s30 }
  0x65   : > { %501 = vrot.lane.b32.xlu1 %v2865_v13, %s2500_s30  ;;  %499 = vrot.lane.b32.xlu0 %v2868_v14, %s2500_s30 }
  0x69   : > { %505 = vrot.lane.b32.xlu1 %v2875_v15, %s2500_s30  ;;  %503 = vrot.lane.b32.xlu0 %v2878_v17, %s2500_s30 }
  0x6d   : > { %509 = vrot.lane.b32.xlu1 %v2885_v18, %s2500_s30  ;;  %507 = vrot.lane.b32.xlu0 %v2888_v21, %s2500_s30 }
  0x71   : > { %513 = vrot.lane.b32.xlu1 %v438_v29, %s2500_s30  ;;  %511 = vrot.lane.b32.xlu0 %v437_v30, %s2500_s30  ;;  %v2921_v29 = vld [vmem:[%s2582_s28 + $0xfa] sm:$0xff]  ;;  %v2924_v30 = vld [vmem:[%s2582_s28 + $0xf2] sm:$0xff] }
  0x75   : > { %517 = vrot.lane.b32.xlu1 %v440_v58, %s2500_s30  ;;  %515 = vrot.lane.b32.xlu0 %v439_v59, %s2500_s30  ;;  %v2931_v58 = vld [vmem:[%s2582_s28 + $0x112] sm:$0xff]  ;;  %v2934_v59 = vld [vmem:[%s2582_s28 + $0x10a] sm:$0xff] }
  0x79   : > { %521 = vrot.lane.b32.xlu1 %v442_v60, %s2500_s30  ;;  %519 = vrot.lane.b32.xlu0 %v441_v61, %s2500_s30  ;;  %v2941_v60 = vld [vmem:[%s2582_s28 + $0x12a] sm:$0xff]  ;;  %v2944_v61 = vld [vmem:[%s2582_s28 + $0x122] sm:$0xff] }
  0x7d   : > { %525 = vrot.lane.b32.xlu1 %v444_v62, %s2500_s30  ;;  %523 = vrot.lane.b32.xlu0 %v443_v63, %s2500_s30  ;;  %v2951_v62 = vld [vmem:[%s2582_s28 + $0x142] sm:$0xff]  ;;  %v2954_v63 = vld [vmem:[%s2582_s28 + $0x13a] sm:$0xff] }
  0x7e   : > { %3702 = vst [vmem:[#allocation14_spill] sm:$0xff] %v2954_v63 }
  0x81   : > { %529 = vrot.lane.b32.xlu1 %v2911_v1, %s2500_s30  ;;  %527 = vrot.lane.b32.xlu0 %v2914_v3, %s2500_s30 }
  0x85   : > { %533 = vrot.lane.b32.xlu1 %v2921_v29, %s2500_s30  ;;  %531 = vrot.lane.b32.xlu0 %v2924_v30, %s2500_s30 }
  0x89   : > { %537 = vrot.lane.b32.xlu1 %v2931_v58, %s2500_s30  ;;  %535 = vrot.lane.b32.xlu0 %v2934_v59, %s2500_s30 }
  0x8d   : > { %541 = vrot.lane.b32.xlu1 %v2941_v60, %s2500_s30  ;;  %539 = vrot.lane.b32.xlu0 %v2944_v61, %s2500_s30 }
  0x8f   : > { %v303_v57 = vpop.permute.xlu1 %302  ;;  %v299_v56 = vpop.permute.xlu0 %298 }
  0x90   : > { %397 = vst.msk [vmem:[#allocation2 + $0x10] sm:$0xff] %vm394_vm1, %v303_v57  ;;  %395 = vst.msk [vmem:[#allocation2] sm:$0xff] %vm394_vm1, %v299_v56  ;;  %v458_v57 = vld [vmem:[%s2582_s28 + $0x172] sm:$0xff]  ;;  %v457_v56 = vld [vmem:[%s2582_s28 + $0x16a] sm:$0xff] }
  0x91   : > { %545 = vrot.lane.b32.xlu1 %v2951_v62, %s2500_s30  ;;  %543 = vrot.lane.b32.xlu0 %v2954_v63, %s2500_s30 }
  0x93   : > { %v305_v49 = vpop.permute.xlu1 %304  ;;  %v301_v48 = vpop.permute.xlu0 %300 }
  0x94   : > { %398 = vst.msk [vmem:[#allocation2 + $0x18] sm:$0xff] %vm394_vm1, %v305_v49  ;;  %396 = vst.msk [vmem:[#allocation2 + $0x8] sm:$0xff] %vm394_vm1, %v301_v48 }
  0x95   : > { %549 = vrot.lane.b32.xlu1 %v456_v53, %s2500_s30  ;;  %547 = vrot.lane.b32.xlu0 %v455_v52, %s2500_s30 }
  0x97   : > { %v309_v21 = vpop.permute.xlu1 %308  ;;  %v307_v18 = vpop.permute.xlu0 %306 }
  0x98   : > { %400 = vst.msk [vmem:[#allocation2 + $0x28] sm:$0xff] %vm394_vm1, %v309_v21  ;;  %399 = vst.msk [vmem:[#allocation2 + $0x20] sm:$0xff] %vm394_vm1, %v307_v18 }
  0x99   : > { %553 = vrot.lane.b32.xlu1 %v458_v57, %s2500_s30  ;;  %551 = vrot.lane.b32.xlu0 %v457_v56, %s2500_s30  ;;  %s3631_s30 = scalar_lea.hbm %s3676_s3, %s2302_s25 }
  0x9b   : > { %v313_v63 = vpop.permute.xlu1 %312  ;;  %v311_v49 = vpop.permute.xlu0 %310 }
  0x9c   : > { %402 = vst.msk [vmem:[#allocation2 + $0x38] sm:$0xff] %vm394_vm1, %v313_v63  ;;  %401 = vst.msk [vmem:[#allocation2 + $0x30] sm:$0xff] %vm394_vm1, %v311_v49 }
  0x9d   : > { %687 = vrot.lane.b32.xlu1 %v2642_v16, %s2501_s4  ;;  %685 = vrot.lane.b32.xlu0 %v2633_v12, %s2501_s4 }
  0x9f   : > { %v317_v48 = vpop.permute.xlu1 %316  ;;  %v315_v52 = vpop.permute.xlu0 %314 }
  0xa0   : > { %404 = vst.msk [vmem:[#allocation2 + $0x48] sm:$0xff] %vm394_vm1, %v317_v48  ;;  %403 = vst.msk [vmem:[#allocation2 + $0x40] sm:$0xff] %vm394_vm1, %v315_v52 }
  0xa1   : > { %691 = vrot.lane.b32.xlu1 %v2650_v19, %s2501_s4  ;;  %689 = vrot.lane.b32.xlu0 %v2653_v20, %s2501_s4 }
  0xa3   : > { %v321_v53 = vpop.permute.xlu1 %320  ;;  %v319_v18 = vpop.permute.xlu0 %318 }
  0xa4   : > { %406 = vst.msk [vmem:[#allocation2 + $0x58] sm:$0xff] %vm394_vm1, %v321_v53  ;;  %405 = vst.msk [vmem:[#allocation2 + $0x50] sm:$0xff] %vm394_vm1, %v319_v18 }
  0xa5   : > { %695 = vrot.lane.b32.xlu1 %v2663_v22, %s2501_s4  ;;  %693 = vrot.lane.b32.xlu0 %v2668_v23, %s2501_s4 }
  0xa7   : > { %v325_v12 = vpop.permute.xlu1 %324  ;;  %v323_v16 = vpop.permute.xlu0 %322 }
  0xa8   : > { %408 = vst.msk [vmem:[#allocation2 + $0x68] sm:$0xff] %vm394_vm1, %v325_v12  ;;  %407 = vst.msk [vmem:[#allocation2 + $0x60] sm:$0xff] %vm394_vm1, %v323_v16 }
  0xa9   : > { %699 = vrot.lane.b32.xlu1 %v2671_v24, %s2501_s4  ;;  %697 = vrot.lane.b32.xlu0 %v2674_v25, %s2501_s4 }
  0xab   : > { %v329_v21 = vpop.permute.xlu1 %328  ;;  %v327_v63 = vpop.permute.xlu0 %326 }
  0xac   : > { %410 = vst.msk [vmem:[#allocation2 + $0x78] sm:$0xff] %vm394_vm1, %v329_v21  ;;  %409 = vst.msk [vmem:[#allocation2 + $0x70] sm:$0xff] %vm394_vm1, %v327_v63 }
  0xad   : > { %703 = vrot.lane.b32.xlu1 %v2683_v26, %s2501_s4  ;;  %701 = vrot.lane.b32.xlu0 %v2686_v27, %s2501_s4 }
  0xaf   : > { %v333_v57 = vpop.permute.xlu1 %332  ;;  %v331_v56 = vpop.permute.xlu0 %330 }
  0xb0   : > { %412 = vst.msk [vmem:[#allocation2 + $0x88] sm:$0xff] %vm394_vm1, %v333_v57  ;;  %411 = vst.msk [vmem:[#allocation2 + $0x80] sm:$0xff] %vm394_vm1, %v331_v56 }
  0xb1   : > { %707 = vrot.lane.b32.xlu1 %v2689_v28, %s2501_s4  ;;  %705 = vrot.lane.b32.xlu0 %v2700_v31, %s2501_s4 }
  0xb3   : > { %v337_v49 = vpop.permute.xlu1 %336  ;;  %v335_v48 = vpop.permute.xlu0 %334 }
  0xb4   : > { %414 = vst.msk [vmem:[#allocation2 + $0x98] sm:$0xff] %vm394_vm1, %v337_v49  ;;  %413 = vst.msk [vmem:[#allocation2 + $0x90] sm:$0xff] %vm394_vm1, %v335_v48 }
  0xb5   : > { %711 = vrot.lane.b32.xlu1 %v2703_v32, %s2501_s4  ;;  %709 = vrot.lane.b32.xlu0 %v2706_v33, %s2501_s4 }
  0xb7   : > { %v341_v52 = vpop.permute.xlu1 %340  ;;  %v339_v53 = vpop.permute.xlu0 %338 }
  0xb8   : > { %416 = vst.msk [vmem:[#allocation2 + $0xa8] sm:$0xff] %vm394_vm1, %v341_v52  ;;  %415 = vst.msk [vmem:[#allocation2 + $0xa0] sm:$0xff] %vm394_vm1, %v339_v53 }
  0xb9   : > { %715 = vrot.lane.b32.xlu1 %v2717_v34, %s2501_s4  ;;  %713 = vrot.lane.b32.xlu0 %v2720_v35, %s2501_s4 }
  0xbb   : > { %v345_v18 = vpop.permute.xlu1 %344  ;;  %v343_v12 = vpop.permute.xlu0 %342 }
  0xbc   : > { %418 = vst.msk [vmem:[#allocation2 + $0xb8] sm:$0xff] %vm394_vm1, %v345_v18  ;;  %417 = vst.msk [vmem:[#allocation2 + $0xb0] sm:$0xff] %vm394_vm1, %v343_v12 }
  0xbd   : > { %719 = vrot.lane.b32.xlu1 %v2727_v36, %s2501_s4  ;;  %717 = vrot.lane.b32.xlu0 %v2730_v37, %s2501_s4 }
  0xbf   : > { %v349_v32 = vpop.permute.xlu1 %348  ;;  %v347_v33 = vpop.permute.xlu0 %346 }
  0xc0   : > { %420 = vst.msk [vmem:[#allocation2 + $0xc8] sm:$0xff] %vm394_vm1, %v349_v32  ;;  %419 = vst.msk [vmem:[#allocation2 + $0xc0] sm:$0xff] %vm394_vm1, %v347_v33 }
  0xc1   : > { %912 = vrot.lane.b32.xlu1 %v2759_v42, %s2502_s5  ;;  %910 = vrot.lane.b32.xlu0 %v2762_v43, %s2502_s5 }
  0xc3   : > { %v353_v34 = vpop.permute.xlu1 %352  ;;  %v351_v35 = vpop.permute.xlu0 %350 }
  0xc4   : > { %422 = vst.msk [vmem:[#allocation2 + $0xd8] sm:$0xff] %vm394_vm1, %v353_v34  ;;  %421 = vst.msk [vmem:[#allocation2 + $0xd0] sm:$0xff] %vm394_vm1, %v351_v35 }
  0xc5   : > { %880 = vrot.lane.b32.xlu1 %v2592_v2, %s2502_s5  ;;  %878 = vrot.lane.b32.xlu0 %v2585_v0, %s2502_s5 }
  0xc7   : > { %v357_v36 = vpop.permute.xlu1 %356  ;;  %v355_v37 = vpop.permute.xlu0 %354 }
  0xc8   : > { %424 = vst.msk [vmem:[#allocation2 + $0xe8] sm:$0xff] %vm394_vm1, %v357_v36  ;;  %423 = vst.msk [vmem:[#allocation2 + $0xe0] sm:$0xff] %vm394_vm1, %v355_v37 }
  0xc9   : > { %1105 = vrot.lane.b32.xlu1 %v2911_v1, %s2503_s6  ;;  %1103 = vrot.lane.b32.xlu0 %v2914_v3, %s2503_s6 }
  0xcb   : > { %v361_v42 = vpop.permute.xlu1 %360  ;;  %v359_v43 = vpop.permute.xlu0 %358 }
  0xcc   : > { %426 = vst.msk [vmem:[#allocation2 + $0xf8] sm:$0xff] %vm394_vm1, %v361_v42  ;;  %425 = vst.msk [vmem:[#allocation2 + $0xf0] sm:$0xff] %vm394_vm1, %v359_v43 }
  0xcd   : > { %1073 = vrot.lane.b32.xlu1 %v2855_v10, %s2503_s6  ;;  %1071 = vrot.lane.b32.xlu0 %v2858_v11, %s2503_s6 }
  0xcf   : > { %v494_v0 = vpop.permute.xlu1 %493  ;;  %v492_v2 = vpop.permute.xlu0 %491 }
  0xd0   : > { %589 = vst.msk [vmem:[#allocation2 + $0x8] sm:$0xff] %vm587_vm2, %v494_v0  ;;  %588 = vst.msk [vmem:[#allocation2] sm:$0xff] %vm587_vm2, %v492_v2 }
  0xd1   : > { %1299 = vrot.lane.b32.xlu1 %v2733_v38, %s2504_s7  ;;  %1297 = vrot.lane.b32.xlu0 %v2742_v39, %s2504_s7 }
  0xd3   : > { %v498_v1 = vpop.permute.xlu1 %497  ;;  %v496_v3 = vpop.permute.xlu0 %495 }
  0xd4   : > { %591 = vst.msk [vmem:[#allocation2 + $0x18] sm:$0xff] %vm587_vm2, %v498_v1  ;;  %590 = vst.msk [vmem:[#allocation2 + $0x10] sm:$0xff] %vm587_vm2, %v496_v3 }
  0xd5   : > { %1267 = vrot.lane.b32.xlu1 %v2650_v19, %s2504_s7  ;;  %1265 = vrot.lane.b32.xlu0 %v2653_v20, %s2504_s7 }
  0xd7   : > { %v502_v10 = vpop.permute.xlu1 %501  ;;  %v500_v11 = vpop.permute.xlu0 %499 }
  0xd8   : > { %593 = vst.msk [vmem:[#allocation2 + $0x28] sm:$0xff] %vm587_vm2, %v502_v10  ;;  %592 = vst.msk [vmem:[#allocation2 + $0x20] sm:$0xff] %vm587_vm2, %v500_v11 }
  0xd9   : > { %1492 = vrot.lane.b32.xlu1 %v2779_v46, %s2505_s8  ;;  %1490 = vrot.lane.b32.xlu0 %v2782_v47, %s2505_s8 }
  0xdb   : > { %v506_v16 = vpop.permute.xlu1 %505  ;;  %v504_v21 = vpop.permute.xlu0 %503 }
  0xdc   : > { %595 = vst.msk [vmem:[#allocation2 + $0x38] sm:$0xff] %vm587_vm2, %v506_v16  ;;  %594 = vst.msk [vmem:[#allocation2 + $0x30] sm:$0xff] %vm587_vm2, %v504_v21 }
  0xdd   : > { %1460 = vrot.lane.b32.xlu1 %v2599_v4, %s2505_s8  ;;  %1458 = vrot.lane.b32.xlu0 %v2602_v5, %s2505_s8 }
  0xdf   : > { %v510_v19 = vpop.permute.xlu1 %509  ;;  %v508_v20 = vpop.permute.xlu0 %507 }
  0xe0   : > { %597 = vst.msk [vmem:[#allocation2 + $0x48] sm:$0xff] %vm587_vm2, %v510_v19  ;;  %596 = vst.msk [vmem:[#allocation2 + $0x40] sm:$0xff] %vm587_vm2, %v508_v20  ;;  %v2111_v20 = vld [vmem:[%s2582_s28 + $0x69] sm:$0xff] }
  0xe1   : > { %1685 = vrot.lane.b32.xlu1 %v2921_v29, %s2506_s9  ;;  %1683 = vrot.lane.b32.xlu0 %v2924_v30, %s2506_s9 }
  0xe3   : > { %v514_v63 = vpop.permute.xlu1 %513  ;;  %v512_v57 = vpop.permute.xlu0 %511 }
  0xe4   : > { %599 = vst.msk [vmem:[#allocation2 + $0x58] sm:$0xff] %vm587_vm2, %v514_v63  ;;  %598 = vst.msk [vmem:[#allocation2 + $0x50] sm:$0xff] %vm587_vm2, %v512_v57  ;;  %v2110_v63 = vld [vmem:[%s2582_s28 + $0x61] sm:$0xff] }
  0xe5   : > { %1653 = vrot.lane.b32.xlu1 %v2865_v13, %s2506_s9  ;;  %1651 = vrot.lane.b32.xlu0 %v2868_v14, %s2506_s9 }
  0xe7   : > { %v518_v56 = vpop.permute.xlu1 %517  ;;  %v516_v49 = vpop.permute.xlu0 %515 }
  0xe8   : > { %601 = vst.msk [vmem:[#allocation2 + $0x68] sm:$0xff] %vm587_vm2, %v518_v56  ;;  %600 = vst.msk [vmem:[#allocation2 + $0x60] sm:$0xff] %vm587_vm2, %v516_v49 }
  0xe9   : > { %723 = vrot.lane.b32.xlu1 %v2733_v38, %s2501_s4  ;;  %721 = vrot.lane.b32.xlu0 %v2742_v39, %s2501_s4 }
  0xeb   : > { %v522_v48 = vpop.permute.xlu1 %521  ;;  %v520_v52 = vpop.permute.xlu0 %519 }
  0xec   : > { %603 = vst.msk [vmem:[#allocation2 + $0x78] sm:$0xff] %vm587_vm2, %v522_v48  ;;  %602 = vst.msk [vmem:[#allocation2 + $0x70] sm:$0xff] %vm587_vm2, %v520_v52  ;;  %v3706_v48 = vld [vmem:[#allocation7_spill] sm:$0xff] }
  0xed   : > { %916 = vrot.lane.b32.xlu1 %v2779_v46, %s2502_s5  ;;  %914 = vrot.lane.b32.xlu0 %v2782_v47, %s2502_s5 }
  0xef   : > { %v526_v53 = vpop.permute.xlu1 %525  ;;  %v524_v18 = vpop.permute.xlu0 %523 }
  0xf0   : > { %605 = vst.msk [vmem:[#allocation2 + $0x88] sm:$0xff] %vm587_vm2, %v526_v53  ;;  %604 = vst.msk [vmem:[#allocation2 + $0x80] sm:$0xff] %vm587_vm2, %v524_v18  ;;  %v2223_v18 = vld [vmem:[%s2582_s28 + $0x141] sm:$0xff] }
  0xf1   : > { %884 = vrot.lane.b32.xlu1 %v2599_v4, %s2502_s5  ;;  %882 = vrot.lane.b32.xlu0 %v2602_v5, %s2502_s5 }
  0xf3   : > { %v530_v38 = vpop.permute.xlu1 %529  ;;  %v528_v39 = vpop.permute.xlu0 %527 }
  0xf4   : > { %607 = vst.msk [vmem:[#allocation2 + $0x98] sm:$0xff] %vm587_vm2, %v530_v38  ;;  %606 = vst.msk [vmem:[#allocation2 + $0x90] sm:$0xff] %vm587_vm2, %v528_v39  ;;  %v2222_v38 = vld [vmem:[%s2582_s28 + $0x139] sm:$0xff] }
  0xf5   : > { %1109 = vrot.lane.b32.xlu1 %v2921_v29, %s2503_s6  ;;  %1107 = vrot.lane.b32.xlu0 %v2924_v30, %s2503_s6 }
  0xf7   : > { %v534_v46 = vpop.permute.xlu1 %533  ;;  %v532_v47 = vpop.permute.xlu0 %531 }
  0xf8   : > { %609 = vst.msk [vmem:[#allocation2 + $0xa8] sm:$0xff] %vm587_vm2, %v534_v46  ;;  %608 = vst.msk [vmem:[#allocation2 + $0xa0] sm:$0xff] %vm587_vm2, %v532_v47 }
  0xf9   : > { %1077 = vrot.lane.b32.xlu1 %v2865_v13, %s2503_s6  ;;  %1075 = vrot.lane.b32.xlu0 %v2868_v14, %s2503_s6 }
  0xfb   : > { %v538_v4 = vpop.permute.xlu1 %537  ;;  %v536_v5 = vpop.permute.xlu0 %535 }
  0xfc   : > { %611 = vst.msk [vmem:[#allocation2 + $0xb8] sm:$0xff] %vm587_vm2, %v538_v4  ;;  %610 = vst.msk [vmem:[#allocation2 + $0xb0] sm:$0xff] %vm587_vm2, %v536_v5 }
  0xfd   : > { %1303 = vrot.lane.b32.xlu1 %v2745_v40, %s2504_s7  ;;  %1301 = vrot.lane.b32.xlu0 %v2748_v41, %s2504_s7 }
  0xff   : > { %v542_v29 = vpop.permute.xlu1 %541  ;;  %v540_v30 = vpop.permute.xlu0 %539 }
 0x100   : > { %613 = vst.msk [vmem:[#allocation2 + $0xc8] sm:$0xff] %vm587_vm2, %v542_v29  ;;  %612 = vst.msk [vmem:[#allocation2 + $0xc0] sm:$0xff] %vm587_vm2, %v540_v30  ;;  %v2206_v29 = vld [vmem:[%s2582_s28 + $0x79] sm:$0xff] }
 0x101   : > { %1271 = vrot.lane.b32.xlu1 %v2663_v22, %s2504_s7  ;;  %1269 = vrot.lane.b32.xlu0 %v2668_v23, %s2504_s7 }
 0x103   : > { %v546_v13 = vpop.permute.xlu1 %545  ;;  %v544_v14 = vpop.permute.xlu0 %543 }
 0x104   : > { %615 = vst.msk [vmem:[#allocation2 + $0xd8] sm:$0xff] %vm587_vm2, %v546_v13  ;;  %614 = vst.msk [vmem:[#allocation2 + $0xd0] sm:$0xff] %vm587_vm2, %v544_v14 }
 0x105   : > { %1496 = vrot.lane.b32.xlu1 %v2799_v50, %s2505_s8  ;;  %1494 = vrot.lane.b32.xlu0 %v2802_v51, %s2505_s8 }
 0x107   : > { %v550_v12 = vpop.permute.xlu1 %549  ;;  %v548_v32 = vpop.permute.xlu0 %547 }
 0x108   : > { %617 = vst.msk [vmem:[#allocation2 + $0xe8] sm:$0xff] %vm587_vm2, %v550_v12  ;;  %616 = vst.msk [vmem:[#allocation2 + $0xe0] sm:$0xff] %vm587_vm2, %v548_v32 }
 0x109   : > { %1464 = vrot.lane.b32.xlu1 %v2609_v6, %s2505_s8  ;;  %1462 = vrot.lane.b32.xlu0 %v2612_v7, %s2505_s8 }
 0x10b   : > { %v554_v22 = vpop.permute.xlu1 %553  ;;  %v552_v23 = vpop.permute.xlu0 %551 }
 0x10c   : > { %619 = vst.msk [vmem:[#allocation2 + $0xf8] sm:$0xff] %vm587_vm2, %v554_v22  ;;  %618 = vst.msk [vmem:[#allocation2 + $0xf0] sm:$0xff] %vm587_vm2, %v552_v23 }
 0x10d   : > { %1689 = vrot.lane.b32.xlu1 %v2931_v58, %s2506_s9  ;;  %1687 = vrot.lane.b32.xlu0 %v2934_v59, %s2506_s9 }
 0x10f   : > { %v688_v33 = vpop.permute.xlu1 %687  ;;  %v686_v34 = vpop.permute.xlu0 %685 }
 0x110   : > { %783 = vst.msk [vmem:[#allocation2 + $0x8] sm:$0xff] %vm781_vm3, %v688_v33  ;;  %782 = vst.msk [vmem:[#allocation2] sm:$0xff] %vm781_vm3, %v686_v34  ;;  %v3709_v33 = vld [vmem:[#allocation14_spill] sm:$0xff] }
 0x111   : > { %1657 = vrot.lane.b32.xlu1 %v2875_v15, %s2506_s9  ;;  %1655 = vrot.lane.b32.xlu0 %v2878_v17, %s2506_s9  ;;  %v2239_v34 = vld [vmem:[%s2582_s28 + $0x82] sm:$0xff] }
 0x113   : > { %v692_v35 = vpop.permute.xlu1 %691  ;;  %v690_v36 = vpop.permute.xlu0 %689 }
 0x114   : > { %785 = vst.msk [vmem:[#allocation2 + $0x18] sm:$0xff] %vm781_vm3, %v692_v35  ;;  %784 = vst.msk [vmem:[#allocation2 + $0x10] sm:$0xff] %vm781_vm3, %v690_v36  ;;  %v2238_v35 = vld [vmem:[%s2582_s28 + $0x7a] sm:$0xff] }
 0x115   : > { %727 = vrot.lane.b32.xlu1 %v2745_v40, %s2501_s4  ;;  %725 = vrot.lane.b32.xlu0 %v2748_v41, %s2501_s4 }
 0x117   : > { %v696_v37 = vpop.permute.xlu1 %695  ;;  %v694_v42 = vpop.permute.xlu0 %693 }
 0x118   : > { %787 = vst.msk [vmem:[#allocation2 + $0x28] sm:$0xff] %vm781_vm3, %v696_v37  ;;  %786 = vst.msk [vmem:[#allocation2 + $0x20] sm:$0xff] %vm781_vm3, %v694_v42 }
 0x119   : > { %920 = vrot.lane.b32.xlu1 %v2799_v50, %s2502_s5  ;;  %918 = vrot.lane.b32.xlu0 %v2802_v51, %s2502_s5 }
 0x11b   : > { %v700_v43 = vpop.permute.xlu1 %699  ;;  %v698_v0 = vpop.permute.xlu0 %697 }
 0x11c   : > { %789 = vst.msk [vmem:[#allocation2 + $0x38] sm:$0xff] %vm781_vm3, %v700_v43  ;;  %788 = vst.msk [vmem:[#allocation2 + $0x30] sm:$0xff] %vm781_vm3, %v698_v0 }
 0x11d   : > { %888 = vrot.lane.b32.xlu1 %v2609_v6, %s2502_s5  ;;  %886 = vrot.lane.b32.xlu0 %v2612_v7, %s2502_s5 }
 0x11f   : > { %v704_v40 = vpop.permute.xlu1 %703  ;;  %v702_v41 = vpop.permute.xlu0 %701 }
 0x120   : > { %791 = vst.msk [vmem:[#allocation2 + $0x48] sm:$0xff] %vm781_vm3, %v704_v40  ;;  %790 = vst.msk [vmem:[#allocation2 + $0x40] sm:$0xff] %vm781_vm3, %v702_v41 }
 0x121   : > { %1113 = vrot.lane.b32.xlu1 %v2931_v58, %s2503_s6  ;;  %1111 = vrot.lane.b32.xlu0 %v2934_v59, %s2503_s6 }
 0x123   : > { %v708_v50 = vpop.permute.xlu1 %707  ;;  %v706_v51 = vpop.permute.xlu0 %705 }
 0x124   : > { %793 = vst.msk [vmem:[#allocation2 + $0x58] sm:$0xff] %vm781_vm3, %v708_v50  ;;  %792 = vst.msk [vmem:[#allocation2 + $0x50] sm:$0xff] %vm781_vm3, %v706_v51  ;;  %v2161_v50 = vld [vmem:[%s2582_s28 + $0x142] sm:$0xff]  ;;  %v2160_v51 = vld [vmem:[%s2582_s28 + $0x13a] sm:$0xff] }
 0x125   : > { %1081 = vrot.lane.b32.xlu1 %v2875_v15, %s2503_s6  ;;  %1079 = vrot.lane.b32.xlu0 %v2878_v17, %s2503_s6 }
 0x127   : > { %v712_v6 = vpop.permute.xlu1 %711  ;;  %v710_v7 = vpop.permute.xlu0 %709 }
 0x128   : > { %795 = vst.msk [vmem:[#allocation2 + $0x68] sm:$0xff] %vm781_vm3, %v712_v6  ;;  %794 = vst.msk [vmem:[#allocation2 + $0x60] sm:$0xff] %vm781_vm3, %v710_v7 }
 0x129   : > { %1307 = vrot.lane.b32.xlu1 %v2765_v44, %s2504_s7  ;;  %1305 = vrot.lane.b32.xlu0 %v2768_v45, %s2504_s7 }
 0x12b   : > { %v716_v58 = vpop.permute.xlu1 %715  ;;  %v714_v59 = vpop.permute.xlu0 %713 }
 0x12c   : > { %797 = vst.msk [vmem:[#allocation2 + $0x78] sm:$0xff] %vm781_vm3, %v716_v58  ;;  %796 = vst.msk [vmem:[#allocation2 + $0x70] sm:$0xff] %vm781_vm3, %v714_v59 }
 0x12d   : > { %1275 = vrot.lane.b32.xlu1 %v2671_v24, %s2504_s7  ;;  %1273 = vrot.lane.b32.xlu0 %v2674_v25, %s2504_s7 }
 0x12f   : > { %v720_v15 = vpop.permute.xlu1 %719  ;;  %v718_v17 = vpop.permute.xlu0 %717 }
 0x130   : > { %799 = vst.msk [vmem:[#allocation2 + $0x88] sm:$0xff] %vm781_vm3, %v720_v15  ;;  %798 = vst.msk [vmem:[#allocation2 + $0x80] sm:$0xff] %vm781_vm3, %v718_v17 }
 0x131   : > { %1500 = vrot.lane.b32.xlu1 %v2819_v54, %s2505_s8  ;;  %1498 = vrot.lane.b32.xlu0 %v2822_v55, %s2505_s8 }
 0x133   : > { %v913_v2 = vpop.permute.xlu1 %912  ;;  %v911_v1 = vpop.permute.xlu0 %910 }
 0x134   : > { %992 = vst.msk [vmem:[#allocation2 + $0x88] sm:$0xff] %vm974_vm4, %v913_v2  ;;  %991 = vst.msk [vmem:[#allocation2 + $0x80] sm:$0xff] %vm974_vm4, %v911_v1  ;;  %v3710_v2 = vld [vmem:[#allocation8_spill] sm:$0xff]  ;;  %v3711_v1 = vld [vmem:[#allocation9_spill] sm:$0xff] }
 0x135   : > { %1468 = vrot.lane.b32.xlu1 %v2619_v8, %s2505_s8  ;;  %1466 = vrot.lane.b32.xlu0 %v2622_v9, %s2505_s8  ;;  %v3703_v8 = vld [vmem:[#allocation12_spill] sm:$0xff]  ;;  %v3704_v9 = vld [vmem:[#allocation13_spill] sm:$0xff] }
 0x137   : > { %v881_v24 = vpop.permute.xlu1 %880  ;;  %v879_v25 = vpop.permute.xlu0 %878 }
 0x138   : > { %976 = vst.msk [vmem:[#allocation2 + $0x8] sm:$0xff] %vm974_vm4, %v881_v24  ;;  %975 = vst.msk [vmem:[#allocation2] sm:$0xff] %vm974_vm4, %v879_v25 }
 0x139   : > { %1693 = vrot.lane.b32.xlu1 %v2941_v60, %s2506_s9  ;;  %1691 = vrot.lane.b32.xlu0 %v2944_v61, %s2506_s9 }
 0x13b   : > { %v1106_v3 = vpop.permute.xlu1 %1105  ;;  %v1104_v10 = vpop.permute.xlu0 %1103 }
 0x13c   : > { %1185 = vst.msk [vmem:[#allocation2 + $0x88] sm:$0xff] %vm1167_vm5, %v1106_v3  ;;  %1184 = vst.msk [vmem:[#allocation2 + $0x80] sm:$0xff] %vm1167_vm5, %v1104_v10  ;;  %v2225_v3 = vld [vmem:[%s2582_s28 + $0x159] sm:$0xff]  ;;  %v2224_v10 = vld [vmem:[%s2582_s28 + $0x151] sm:$0xff] }
 0x13d   : > { %1661 = vrot.lane.b32.xlu1 %v3703_v8, %s2506_s9  ;;  %1659 = vrot.lane.b32.xlu0 %v3704_v9, %s2506_s9 }
 0x13f   : > { %v1074_v11 = vpop.permute.xlu1 %1073  ;;  %v1072_v16 = vpop.permute.xlu0 %1071 }
 0x140   : > { %1169 = vst.msk [vmem:[#allocation2 + $0x8] sm:$0xff] %vm1167_vm5, %v1074_v11  ;;  %1168 = vst.msk [vmem:[#allocation2] sm:$0xff] %vm1167_vm5, %v1072_v16 }
 0x141   : > { %731 = vrot.lane.b32.xlu1 %v2765_v44, %s2501_s4  ;;  %729 = vrot.lane.b32.xlu0 %v2768_v45, %s2501_s4 }
 0x143   : > { %v1300_v21 = vpop.permute.xlu1 %1299  ;;  %v1298_v19 = vpop.permute.xlu0 %1297 }
 0x144   : > { %1379 = vst.msk [vmem:[#allocation2 + $0x88] sm:$0xff] %vm1361_vm6, %v1300_v21  ;;  %1378 = vst.msk [vmem:[#allocation2 + $0x80] sm:$0xff] %vm1361_vm6, %v1298_v19 }
 0x145   : > { %924 = vrot.lane.b32.xlu1 %v2819_v54, %s2502_s5  ;;  %922 = vrot.lane.b32.xlu0 %v2822_v55, %s2502_s5 }
 0x147   : > { %v1268_v57 = vpop.permute.xlu1 %1267  ;;  %v1266_v44 = vpop.permute.xlu0 %1265 }
 0x148   : > { %1363 = vst.msk [vmem:[#allocation2 + $0x8] sm:$0xff] %vm1361_vm6, %v1268_v57  ;;  %1362 = vst.msk [vmem:[#allocation2] sm:$0xff] %vm1361_vm6, %v1266_v44 }
 0x149   : > { %892 = vrot.lane.b32.xlu1 %v2111_v20, %s2502_s5  ;;  %890 = vrot.lane.b32.xlu0 %v2110_v63, %s2502_s5 }
 0x14b   : > { %v1493_v45 = vpop.permute.xlu1 %1492  ;;  %v1491_v56 = vpop.permute.xlu0 %1490 }
 0x14c   : > { %1572 = vst.msk [vmem:[#allocation2 + $0x88] sm:$0xff] %vm1554_vm7, %v1493_v45  ;;  %1571 = vst.msk [vmem:[#allocation2 + $0x80] sm:$0xff] %vm1554_vm7, %v1491_v56  ;;  %v2257_v45 = vld [vmem:[%s2582_s28 + $0x15a] sm:$0xff]  ;;  %v2256_v56 = vld [vmem:[%s2582_s28 + $0x152] sm:$0xff] }
 0x14d   : > { %1117 = vrot.lane.b32.xlu1 %v2941_v60, %s2503_s6  ;;  %1115 = vrot.lane.b32.xlu0 %v2944_v61, %s2503_s6  ;;  %v3705_v61 = vld [vmem:[#allocation6_spill] sm:$0xff] }
 0x14f   : > { %v1461_v54 = vpop.permute.xlu1 %1460  ;;  %v1459_v55 = vpop.permute.xlu0 %1458 }
 0x150   : > { %1556 = vst.msk [vmem:[#allocation2 + $0x8] sm:$0xff] %vm1554_vm7, %v1461_v54  ;;  %1555 = vst.msk [vmem:[#allocation2] sm:$0xff] %vm1554_vm7, %v1459_v55 }
 0x151   : > { %1085 = vrot.lane.b32.xlu1 %v3703_v8, %s2503_s6  ;;  %1083 = vrot.lane.b32.xlu0 %v3704_v9, %s2503_s6 }
 0x153   : > { %v1686_v49 = vpop.permute.xlu1 %1685  ;;  %v1684_v60 = vpop.permute.xlu0 %1683 }
 0x154   : > { %1765 = vst.msk [vmem:[#allocation2 + $0x88] sm:$0xff] %vm1747_vm8, %v1686_v49  ;;  %1764 = vst.msk [vmem:[#allocation2 + $0x80] sm:$0xff] %vm1747_vm8, %v1684_v60  ;;  %v2241_v49 = vld [vmem:[%s2582_s28 + $0x9a] sm:$0xff]  ;;  %v2240_v60 = vld [vmem:[%s2582_s28 + $0x92] sm:$0xff] }
 0x155   : > { %1311 = vrot.lane.b32.xlu1 %v3705_v61, %s2504_s7  ;;  %1309 = vrot.lane.b32.xlu0 %v3706_v48, %s2504_s7 }
 0x157   : > { %v1654_v52 = vpop.permute.xlu1 %1653  ;;  %v1652_v53 = vpop.permute.xlu0 %1651 }
 0x158   : > { %1749 = vst.msk [vmem:[#allocation2 + $0x8] sm:$0xff] %vm1747_vm8, %v1654_v52  ;;  %1748 = vst.msk [vmem:[#allocation2] sm:$0xff] %vm1747_vm8, %v1652_v53 }
 0x159   : > { %1279 = vrot.lane.b32.xlu1 %v2683_v26, %s2504_s7  ;;  %1277 = vrot.lane.b32.xlu0 %v2686_v27, %s2504_s7  ;;  %v2207_v27 = vld [vmem:[%s2582_s28 + $0x81] sm:$0xff] }
 0x15b   : > { %v724_v39 = vpop.permute.xlu1 %723  ;;  %v722_v46 = vpop.permute.xlu0 %721  ;;  %v1797_v47 = vld [vmem:[#allocation2 + $0x80] sm:$0xff]  ;;  %v1798_v4 = vld [vmem:[#allocation2 + $0x88] sm:$0xff] }
 0x15c   : > { %801 = vst.msk [vmem:[#allocation2 + $0x98] sm:$0xff] %vm781_vm3, %v724_v39  ;;  %800 = vst.msk [vmem:[#allocation2 + $0x90] sm:$0xff] %vm781_vm3, %v722_v46  ;;  %v2337_v26 = vpack.c.bf16 %v1798_v4, %v1797_v47 }
 0x15d   : > { %1504 = vrot.lane.b32.xlu1 %v2223_v18, %s2505_s8  ;;  %1502 = vrot.lane.b32.xlu0 %v2222_v38, %s2505_s8 }
 0x15e   : > { %2339 = vmatprep.subr.msk.bf16.mxu0 %vm3266_vm10, %v2337_v26 }
 0x15f   : > { %v917_v30 = vpop.permute.xlu1 %916  ;;  %v915_v13 = vpop.permute.xlu0 %914  ;;  %v1781_v14 = vld [vmem:[#allocation2] sm:$0xff]  ;;  %v1782_v12 = vld [vmem:[#allocation2 + $0x8] sm:$0xff] }
 0x160   : > { %994 = vst.msk [vmem:[#allocation2 + $0x98] sm:$0xff] %vm974_vm4, %v917_v30  ;;  %993 = vst.msk [vmem:[#allocation2 + $0x90] sm:$0xff] %vm974_vm4, %v915_v13  ;;  %v2340_v32 = vpack.c.bf16 %v1782_v12, %v1781_v14  ;;  %v3712_v13 = vld [vmem:[#allocation10_spill] sm:$0xff]  ;;  %v3713_v14 = vld [vmem:[#allocation11_spill] sm:$0xff] }
 0x161   : > { %1472 = vrot.lane.b32.xlu1 %v2207_v27, %s2505_s8  ;;  %1470 = vrot.lane.b32.xlu0 %v2206_v29, %s2505_s8  ;;  %v2179_v12 = vld [vmem:[%s2582_s28 + $0xb0] sm:$0xff] }
 0x162   : > { %2342 = vmatpush3.bf16.xpose.msk.msra.mxu0 %vm3266_vm10, %v2340_v32  ;;  %v2178_v32 = vld [vmem:[%s2582_s28 + $0xa8] sm:$0xff] }
 0x163   : > { %v885_v22 = vpop.permute.xlu1 %884  ;;  %v883_v23 = vpop.permute.xlu0 %882 }
 0x164   : > { %978 = vst.msk [vmem:[#allocation2 + $0x18] sm:$0xff] %vm974_vm4, %v885_v22  ;;  %977 = vst.msk [vmem:[#allocation2 + $0x10] sm:$0xff] %vm974_vm4, %v883_v23 }
 0x165   : > { %1697 = vrot.lane.b32.xlu1 %v2951_v62, %s2506_s9  ;;  %1695 = vrot.lane.b32.xlu0 %v3709_v33, %s2506_s9  ;;  %v2227_v33 = vld [vmem:[%s2582_s28 + $0x171] sm:$0xff] }
 0x167   : > { %v1110_v36 = vpop.permute.xlu1 %1109  ;;  %v1108_v37 = vpop.permute.xlu0 %1107 }
 0x168   : > { %1187 = vst.msk [vmem:[#allocation2 + $0x98] sm:$0xff] %vm1167_vm5, %v1110_v36  ;;  %1186 = vst.msk [vmem:[#allocation2 + $0x90] sm:$0xff] %vm1167_vm5, %v1108_v37 }
 0x169   : > { %1665 = vrot.lane.b32.xlu1 %v2239_v34, %s2506_s9  ;;  %1663 = vrot.lane.b32.xlu0 %v2238_v35, %s2506_s9 }
 0x16b   : > { %v1078_v42 = vpop.permute.xlu1 %1077  ;;  %v1076_v43 = vpop.permute.xlu0 %1075 }
 0x16c   : > { %1171 = vst.msk [vmem:[#allocation2 + $0x18] sm:$0xff] %vm1167_vm5, %v1078_v42  ;;  %1170 = vst.msk [vmem:[#allocation2 + $0x10] sm:$0xff] %vm1167_vm5, %v1076_v43 }
 0x16d   : > { %735 = vrot.lane.b32.xlu1 %v3705_v61, %s2501_s4  ;;  %733 = vrot.lane.b32.xlu0 %v3706_v48, %s2501_s4 }
 0x16f   : > { %v1304_v62 = vpop.permute.xlu1 %1303  ;;  %v1302_v0 = vpop.permute.xlu0 %1301 }
 0x170   : > { %1381 = vst.msk [vmem:[#allocation2 + $0x98] sm:$0xff] %vm1361_vm6, %v1304_v62  ;;  %1380 = vst.msk [vmem:[#allocation2 + $0x90] sm:$0xff] %vm1361_vm6, %v1302_v0  ;;  %v2211_v62 = vld [vmem:[%s2582_s28 + $0xb1] sm:$0xff]  ;;  %v2210_v0 = vld [vmem:[%s2582_s28 + $0xa9] sm:$0xff] }
 0x171   : > { %928 = vrot.lane.b32.xlu1 %v2223_v18, %s2502_s5  ;;  %926 = vrot.lane.b32.xlu0 %v2222_v38, %s2502_s5 }
 0x173   : > { %v1272_v40 = vpop.permute.xlu1 %1271  ;;  %v1270_v41 = vpop.permute.xlu0 %1269 }
 0x174   : > { %1365 = vst.msk [vmem:[#allocation2 + $0x18] sm:$0xff] %vm1361_vm6, %v1272_v40  ;;  %1364 = vst.msk [vmem:[#allocation2 + $0x10] sm:$0xff] %vm1361_vm6, %v1270_v41 }
 0x175   : > { %896 = vrot.lane.b32.xlu1 %v2207_v27, %s2502_s5  ;;  %894 = vrot.lane.b32.xlu0 %v2206_v29, %s2502_s5 }
 0x177   : > { %v1497_v6 = vpop.permute.xlu1 %1496  ;;  %v1495_v7 = vpop.permute.xlu0 %1494 }
 0x178   : > { %1574 = vst.msk [vmem:[#allocation2 + $0x98] sm:$0xff] %vm1554_vm7, %v1497_v6  ;;  %1573 = vst.msk [vmem:[#allocation2 + $0x90] sm:$0xff] %vm1554_vm7, %v1495_v7  ;;  %v2259_v7 = vld [vmem:[%s2582_s28 + $0x172] sm:$0xff] }
 0x179   : > { %1121 = vrot.lane.b32.xlu1 %v2161_v50, %s2503_s6  ;;  %1119 = vrot.lane.b32.xlu0 %v2160_v51, %s2503_s6 }
 0x17b   : > { %v1465_v58 = vpop.permute.xlu1 %1464  ;;  %v1463_v59 = vpop.permute.xlu0 %1462 }
 0x17c   : > { %1558 = vst.msk [vmem:[#allocation2 + $0x18] sm:$0xff] %vm1554_vm7, %v1465_v58  ;;  %1557 = vst.msk [vmem:[#allocation2 + $0x10] sm:$0xff] %vm1554_vm7, %v1463_v59  ;;  %v2258_v58 = vld [vmem:[%s2582_s28 + $0x16a] sm:$0xff] }
 0x17d   : > { %1089 = vrot.lane.b32.xlu1 %v2239_v34, %s2503_s6  ;;  %1087 = vrot.lane.b32.xlu0 %v2238_v35, %s2503_s6  ;;  %v2226_v34 = vld [vmem:[%s2582_s28 + $0x169] sm:$0xff] }
 0x17f   : > { %v1690_v15 = vpop.permute.xlu1 %1689  ;;  %v1688_v17 = vpop.permute.xlu0 %1687 }
 0x180   : > { %1767 = vst.msk [vmem:[#allocation2 + $0x98] sm:$0xff] %vm1747_vm8, %v1690_v15  ;;  %1766 = vst.msk [vmem:[#allocation2 + $0x90] sm:$0xff] %vm1747_vm8, %v1688_v17  ;;  %v2243_v17 = vld [vmem:[%s2582_s28 + $0xb2] sm:$0xff] }
 0x181   : > { %1315 = vrot.lane.b32.xlu1 %v3710_v2, %s2504_s7  ;;  %1313 = vrot.lane.b32.xlu0 %v3711_v1, %s2504_s7 }
 0x183   : > { %v1658_v24 = vpop.permute.xlu1 %1657  ;;  %v1656_v25 = vpop.permute.xlu0 %1655 }
 0x184   : > { %1751 = vst.msk [vmem:[#allocation2 + $0x18] sm:$0xff] %vm1747_vm8, %v1658_v24  ;;  %1750 = vst.msk [vmem:[#allocation2 + $0x10] sm:$0xff] %vm1747_vm8, %v1656_v25  ;;  %v2101_v25 = vld [vmem:[%s2582_s28 + $0x170] sm:$0xff] }
 0x185   : > { %1283 = vrot.lane.b32.xlu1 %v2689_v28, %s2504_s7  ;;  %1281 = vrot.lane.b32.xlu0 %v2700_v31, %s2504_s7  ;;  %v2209_v28 = vld [vmem:[%s2582_s28 + $0x99] sm:$0xff]  ;;  %v2208_v31 = vld [vmem:[%s2582_s28 + $0x91] sm:$0xff] }
 0x187   : > { %v728_v8 = vpop.permute.xlu1 %727  ;;  %v726_v9 = vpop.permute.xlu0 %725  ;;  %v1799_v11 = vld [vmem:[#allocation2 + $0x90] sm:$0xff]  ;;  %v1800_v16 = vld [vmem:[#allocation2 + $0x98] sm:$0xff] }
 0x188   : > { %803 = vst.msk [vmem:[#allocation2 + $0xa8] sm:$0xff] %vm781_vm3, %v728_v8  ;;  %802 = vst.msk [vmem:[#allocation2 + $0xa0] sm:$0xff] %vm781_vm3, %v726_v9  ;;  %v2343_v21 = vpack.c.bf16 %v1800_v16, %v1799_v11 }
 0x189   : > { %1508 = vrot.lane.b32.xlu1 %v2225_v3, %s2505_s8  ;;  %1506 = vrot.lane.b32.xlu0 %v2224_v10, %s2505_s8 }
 0x18a   : > { %2345 = vmatprep.subr.msk.bf16.mxu0 %vm3266_vm10, %v2343_v21 }
 0x18b   : > { %v921_v19 = vpop.permute.xlu1 %920  ;;  %v919_v20 = vpop.permute.xlu0 %918  ;;  %v1783_v63 = vld [vmem:[#allocation2 + $0x10] sm:$0xff]  ;;  %v1784_v57 = vld [vmem:[#allocation2 + $0x18] sm:$0xff] }
 0x18c   : > { %996 = vst.msk [vmem:[#allocation2 + $0xa8] sm:$0xff] %vm974_vm4, %v921_v19  ;;  %995 = vst.msk [vmem:[#allocation2 + $0xa0] sm:$0xff] %vm974_vm4, %v919_v20  ;;  %v2346_v44 = vpack.c.bf16 %v1784_v57, %v1783_v63  ;;  %v2197_v63 = vld [vmem:[%s2582_s28 + $0x188] sm:$0xff]  ;;  %v2196_v57 = vld [vmem:[%s2582_s28 + $0x180] sm:$0xff] }
 0x18d   : > { %1476 = vrot.lane.b32.xlu1 %v2209_v28, %s2505_s8  ;;  %1474 = vrot.lane.b32.xlu0 %v2208_v31, %s2505_s8 }
 0x18e   : > { %2348 = vmatpush3.bf16.xpose.msk.msra.mxu0 %vm3266_vm10, %v2346_v44 }
 0x18f   : > { %v889_v54 = vpop.permute.xlu1 %888  ;;  %v887_v55 = vpop.permute.xlu0 %886 }
 0x190   : > { %980 = vst.msk [vmem:[#allocation2 + $0x28] sm:$0xff] %vm974_vm4, %v889_v54  ;;  %979 = vst.msk [vmem:[#allocation2 + $0x20] sm:$0xff] %vm974_vm4, %v887_v55  ;;  %v2180_v54 = vld [vmem:[%s2582_s28 + $0xc0] sm:$0xff] }
 0x191   : > { %1701 = vrot.lane.b32.xlu1 %v2257_v45, %s2506_s9  ;;  %1699 = vrot.lane.b32.xlu0 %v2256_v56, %s2506_s9 }
 0x193   : > { %v1114_v61 = vpop.permute.xlu1 %1113  ;;  %v1112_v48 = vpop.permute.xlu0 %1111 }
 0x194   : > { %1189 = vst.msk [vmem:[#allocation2 + $0xa8] sm:$0xff] %vm1167_vm5, %v1114_v61  ;;  %1188 = vst.msk [vmem:[#allocation2 + $0xa0] sm:$0xff] %vm1167_vm5, %v1112_v48  ;;  %v2228_v61 = vld [vmem:[%s2582_s28 + $0x181] sm:$0xff] }
 0x195   : > { %1669 = vrot.lane.b32.xlu1 %v2241_v49, %s2506_s9  ;;  %1667 = vrot.lane.b32.xlu0 %v2240_v60, %s2506_s9 }
 0x197   : > { %v1082_v52 = vpop.permute.xlu1 %1081  ;;  %v1080_v53 = vpop.permute.xlu0 %1079 }
 0x198   : > { %1173 = vst.msk [vmem:[#allocation2 + $0x28] sm:$0xff] %vm1167_vm5, %v1082_v52  ;;  %1172 = vst.msk [vmem:[#allocation2 + $0x20] sm:$0xff] %vm1167_vm5, %v1080_v53 }
 0x199   : > { %739 = vrot.lane.b32.xlu1 %v3710_v2, %s2501_s4  ;;  %737 = vrot.lane.b32.xlu0 %v3711_v1, %s2501_s4  ;;  %v2242_v2 = vld [vmem:[%s2582_s28 + $0xaa] sm:$0xff] }
 0x19b   : > { %v1308_v18 = vpop.permute.xlu1 %1307  ;;  %v1306_v38 = vpop.permute.xlu0 %1305 }
 0x19c   : > { %1383 = vst.msk [vmem:[#allocation2 + $0xa8] sm:$0xff] %vm1361_vm6, %v1308_v18  ;;  %1382 = vst.msk [vmem:[#allocation2 + $0xa0] sm:$0xff] %vm1361_vm6, %v1306_v38 }
 0x19d   : > { %932 = vrot.lane.b32.xlu1 %v2225_v3, %s2502_s5  ;;  %930 = vrot.lane.b32.xlu0 %v2224_v10, %s2502_s5  ;;  %v2100_v3 = vld [vmem:[%s2582_s28 + $0x168] sm:$0xff] }
 0x19f   : > { %v1276_v39 = vpop.permute.xlu1 %1275  ;;  %v1274_v46 = vpop.permute.xlu0 %1273 }
 0x1a0   : > { %1367 = vst.msk [vmem:[#allocation2 + $0x28] sm:$0xff] %vm1361_vm6, %v1276_v39  ;;  %1366 = vst.msk [vmem:[#allocation2 + $0x20] sm:$0xff] %vm1361_vm6, %v1274_v46  ;;  %v2213_v39 = vld [vmem:[%s2582_s28 + $0xc9] sm:$0xff]  ;;  %v2212_v46 = vld [vmem:[%s2582_s28 + $0xc1] sm:$0xff] }
 0x1a1   : > { %900 = vrot.lane.b32.xlu1 %v2209_v28, %s2502_s5  ;;  %898 = vrot.lane.b32.xlu0 %v2208_v31, %s2502_s5 }
 0x1a3   : > { %v1501_v47 = vpop.permute.xlu1 %1500  ;;  %v1499_v4 = vpop.permute.xlu0 %1498 }
 0x1a4   : > { %1576 = vst.msk [vmem:[#allocation2 + $0xa8] sm:$0xff] %vm1554_vm7, %v1501_v47  ;;  %1575 = vst.msk [vmem:[#allocation2 + $0xa0] sm:$0xff] %vm1554_vm7, %v1499_v4 }
 0x1a5   : > { %1125 = vrot.lane.b32.xlu1 %v2257_v45, %s2503_s6  ;;  %1123 = vrot.lane.b32.xlu0 %v2256_v56, %s2503_s6  ;;  %v2181_v56 = vld [vmem:[%s2582_s28 + $0xc8] sm:$0xff] }
 0x1a7   : > { %v1469_v26 = vpop.permute.xlu1 %1468  ;;  %v1467_v27 = vpop.permute.xlu0 %1466 }
 0x1a8   : > { %1560 = vst.msk [vmem:[#allocation2 + $0x28] sm:$0xff] %vm1554_vm7, %v1469_v26  ;;  %1559 = vst.msk [vmem:[#allocation2 + $0x20] sm:$0xff] %vm1554_vm7, %v1467_v27 }
 0x1a9   : > { %1093 = vrot.lane.b32.xlu1 %v2241_v49, %s2503_s6  ;;  %1091 = vrot.lane.b32.xlu0 %v2240_v60, %s2503_s6  ;;  %v2229_v60 = vld [vmem:[%s2582_s28 + $0x189] sm:$0xff] }
 0x1ab   : > { %v1694_v29 = vpop.permute.xlu1 %1693  ;;  %v1692_v30 = vpop.permute.xlu0 %1691 }
 0x1ac   : > { %1769 = vst.msk [vmem:[#allocation2 + $0xa8] sm:$0xff] %vm1747_vm8, %v1694_v29  ;;  %1768 = vst.msk [vmem:[#allocation2 + $0xa0] sm:$0xff] %vm1747_vm8, %v1692_v30  ;;  %v2261_v30 = vld [vmem:[%s2582_s28 + $0x18a] sm:$0xff] }
 0x1ad   : > { %1319 = vrot.lane.b32.xlu1 %v3712_v13, %s2504_s7  ;;  %1317 = vrot.lane.b32.xlu0 %v3713_v14, %s2504_s7  ;;  %v2260_v13 = vld [vmem:[%s2582_s28 + $0x182] sm:$0xff] }
 0x1af   : > { %v1662_v22 = vpop.permute.xlu1 %1661  ;;  %v1660_v23 = vpop.permute.xlu0 %1659 }
 0x1b0   : > { %1753 = vst.msk [vmem:[#allocation2 + $0x28] sm:$0xff] %vm1747_vm8, %v1662_v22  ;;  %1752 = vst.msk [vmem:[#allocation2 + $0x20] sm:$0xff] %vm1747_vm8, %v1660_v23  ;;  %v2244_v22 = vld [vmem:[%s2582_s28 + $0xc2] sm:$0xff] }
 0x1b1   : > { %1287 = vrot.lane.b32.xlu1 %v2179_v12, %s2504_s7  ;;  %1285 = vrot.lane.b32.xlu0 %v2178_v32, %s2504_s7  ;;  %v2245_v32 = vld [vmem:[%s2582_s28 + $0xca] sm:$0xff] }
 0x1b3   : > { %v732_v35 = vpop.permute.xlu1 %731  ;;  %v730_v36 = vpop.permute.xlu0 %729  ;;  %v1801_v37 = vld [vmem:[#allocation2 + $0xa0] sm:$0xff]  ;;  %v1802_v42 = vld [vmem:[#allocation2 + $0xa8] sm:$0xff] }
 0x1b4   : > { %805 = vst.msk [vmem:[#allocation2 + $0xb8] sm:$0xff] %vm781_vm3, %v732_v35  ;;  %804 = vst.msk [vmem:[#allocation2 + $0xb0] sm:$0xff] %vm781_vm3, %v730_v36  ;;  %v2349_v43 = vpack.c.bf16 %v1802_v42, %v1801_v37 }
 0x1b5   : > { %1512 = vrot.lane.b32.xlu1 %v2227_v33, %s2505_s8  ;;  %1510 = vrot.lane.b32.xlu0 %v2226_v34, %s2505_s8 }
 0x1b6   : > { %2351 = vmatprep.subr.msk.bf16.mxu0 %vm3266_vm10, %v2349_v43 }
 0x1b7   : > { %v925_v40 = vpop.permute.xlu1 %924  ;;  %v923_v41 = vpop.permute.xlu0 %922  ;;  %v1785_v50 = vld [vmem:[#allocation2 + $0x20] sm:$0xff]  ;;  %v1786_v51 = vld [vmem:[#allocation2 + $0x28] sm:$0xff] }
 0x1b8   : > { %998 = vst.msk [vmem:[#allocation2 + $0xb8] sm:$0xff] %vm974_vm4, %v925_v40  ;;  %997 = vst.msk [vmem:[#allocation2 + $0xb0] sm:$0xff] %vm974_vm4, %v923_v41  ;;  %v2352_v6 = vpack.c.bf16 %v1786_v51, %v1785_v50  ;;  %v2199_v50 = vld [vmem:[%s2582_s28 + $0x1a0] sm:$0xff]  ;;  %v2198_v51 = vld [vmem:[%s2582_s28 + $0x198] sm:$0xff] }
 0x1b9   : > { %1480 = vrot.lane.b32.xlu1 %v2211_v62, %s2505_s8  ;;  %1478 = vrot.lane.b32.xlu0 %v2210_v0, %s2505_s8 }
 0x1ba   : > { %2354 = vmatpush3.bf16.xpose.msk.msra.mxu0 %vm3266_vm10, %v2352_v6 }
 0x1bb   : > { %v893_v59 = vpop.permute.xlu1 %892  ;;  %v891_v15 = vpop.permute.xlu0 %890 }
 0x1bc   : > { %982 = vst.msk [vmem:[#allocation2 + $0x38] sm:$0xff] %vm974_vm4, %v893_v59  ;;  %981 = vst.msk [vmem:[#allocation2 + $0x30] sm:$0xff] %vm974_vm4, %v891_v15  ;;  %v2182_v59 = vld [vmem:[%s2582_s28 + $0xd8] sm:$0xff] }
 0x1bd   : > { %1705 = vrot.lane.b32.xlu1 %v2259_v7, %s2506_s9  ;;  %1703 = vrot.lane.b32.xlu0 %v2258_v58, %s2506_s9 }
 0x1bf   : > { %v1118_v1 = vpop.permute.xlu1 %1117  ;;  %v1116_v24 = vpop.permute.xlu0 %1115 }
 0x1c0   : > { %1191 = vst.msk [vmem:[#allocation2 + $0xb8] sm:$0xff] %vm1167_vm5, %v1118_v1  ;;  %1190 = vst.msk [vmem:[#allocation2 + $0xb0] sm:$0xff] %vm1167_vm5, %v1116_v24  ;;  %v2230_v1 = vld [vmem:[%s2582_s28 + $0x199] sm:$0xff] }
 0x1c1   : > { %1673 = vrot.lane.b32.xlu1 %v2243_v17, %s2506_s9  ;;  %1671 = vrot.lane.b32.xlu0 %v2242_v2, %s2506_s9 }
 0x1c3   : > { %v1086_v10 = vpop.permute.xlu1 %1085  ;;  %v1084_v8 = vpop.permute.xlu0 %1083 }
 0x1c4   : > { %1175 = vst.msk [vmem:[#allocation2 + $0x38] sm:$0xff] %vm1167_vm5, %v1086_v10  ;;  %1174 = vst.msk [vmem:[#allocation2 + $0x30] sm:$0xff] %vm1167_vm5, %v1084_v8 }
 0x1c5   : > { %743 = vrot.lane.b32.xlu1 %v2101_v25, %s2501_s4  ;;  %741 = vrot.lane.b32.xlu0 %v2100_v3, %s2501_s4 }
 0x1c7   : > { %v1312_v9 = vpop.permute.xlu1 %1311  ;;  %v1310_v11 = vpop.permute.xlu0 %1309 }
 0x1c8   : > { %1385 = vst.msk [vmem:[#allocation2 + $0xb8] sm:$0xff] %vm1361_vm6, %v1312_v9  ;;  %1384 = vst.msk [vmem:[#allocation2 + $0xb0] sm:$0xff] %vm1361_vm6, %v1310_v11  ;;  %v2215_v9 = vld [vmem:[%s2582_s28 + $0xe1] sm:$0xff]  ;;  %v2214_v11 = vld [vmem:[%s2582_s28 + $0xd9] sm:$0xff] }
 0x1c9   : > { %936 = vrot.lane.b32.xlu1 %v2227_v33, %s2502_s5  ;;  %934 = vrot.lane.b32.xlu0 %v2226_v34, %s2502_s5 }
 0x1cb   : > { %v1280_v16 = vpop.permute.xlu1 %1279  ;;  %v1278_v21 = vpop.permute.xlu0 %1277 }
 0x1cc   : > { %1369 = vst.msk [vmem:[#allocation2 + $0x38] sm:$0xff] %vm1361_vm6, %v1280_v16  ;;  %1368 = vst.msk [vmem:[#allocation2 + $0x30] sm:$0xff] %vm1361_vm6, %v1278_v21 }
 0x1cd   : > { %904 = vrot.lane.b32.xlu1 %v2211_v62, %s2502_s5  ;;  %902 = vrot.lane.b32.xlu0 %v2210_v0, %s2502_s5 }
 0x1cf   : > { %v1505_v28 = vpop.permute.xlu1 %1504  ;;  %v1503_v31 = vpop.permute.xlu0 %1502 }
 0x1d0   : > { %1578 = vst.msk [vmem:[#allocation2 + $0xb8] sm:$0xff] %vm1554_vm7, %v1505_v28  ;;  %1577 = vst.msk [vmem:[#allocation2 + $0xb0] sm:$0xff] %vm1554_vm7, %v1503_v31 }
 0x1d1   : > { %1129 = vrot.lane.b32.xlu1 %v2259_v7, %s2503_s6  ;;  %1127 = vrot.lane.b32.xlu0 %v2258_v58, %s2503_s6  ;;  %v2183_v58 = vld [vmem:[%s2582_s28 + $0xe0] sm:$0xff] }
 0x1d3   : > { %v1473_v19 = vpop.permute.xlu1 %1472  ;;  %v1471_v20 = vpop.permute.xlu0 %1470 }
 0x1d4   : > { %1562 = vst.msk [vmem:[#allocation2 + $0x38] sm:$0xff] %vm1554_vm7, %v1473_v19  ;;  %1561 = vst.msk [vmem:[#allocation2 + $0x30] sm:$0xff] %vm1554_vm7, %v1471_v20  ;;  %v2263_v20 = vld [vmem:[%s2582_s28 + $0x1a2] sm:$0xff] }
 0x1d5   : > { %1097 = vrot.lane.b32.xlu1 %v2243_v17, %s2503_s6  ;;  %1095 = vrot.lane.b32.xlu0 %v2242_v2, %s2503_s6  ;;  %v2231_v2 = vld [vmem:[%s2582_s28 + $0x1a1] sm:$0xff] }
 0x1d7   : > { %v1698_v44 = vpop.permute.xlu1 %1697  ;;  %v1696_v45 = vpop.permute.xlu0 %1695 }
 0x1d8   : > { %1771 = vst.msk [vmem:[#allocation2 + $0xb8] sm:$0xff] %vm1747_vm8, %v1698_v44  ;;  %1770 = vst.msk [vmem:[#allocation2 + $0xb0] sm:$0xff] %vm1747_vm8, %v1696_v45  ;;  %v2247_v45 = vld [vmem:[%s2582_s28 + $0xe2] sm:$0xff] }
 0x1d9   : > { %1323 = vrot.lane.b32.xlu1 %v2197_v63, %s2504_s7  ;;  %1321 = vrot.lane.b32.xlu0 %v2196_v57, %s2504_s7 }
 0x1db   : > { %v1666_v55 = vpop.permute.xlu1 %1665  ;;  %v1664_v49 = vpop.permute.xlu0 %1663 }
 0x1dc   : > { %1755 = vst.msk [vmem:[#allocation2 + $0x38] sm:$0xff] %vm1747_vm8, %v1666_v55  ;;  %1754 = vst.msk [vmem:[#allocation2 + $0x30] sm:$0xff] %vm1747_vm8, %v1664_v49 }
 0x1dd   : > { %1291 = vrot.lane.b32.xlu1 %v2181_v56, %s2504_s7  ;;  %1289 = vrot.lane.b32.xlu0 %v2180_v54, %s2504_s7  ;;  %v2246_v56 = vld [vmem:[%s2582_s28 + $0xda] sm:$0xff] }
 0x1de   : > { %v3543_v54 = vld [vmem:[%s3674_s1] sm:$0xff] }
 0x1df   : > { %v736_v48 = vpop.permute.xlu1 %735  ;;  %v734_v52 = vpop.permute.xlu0 %733  ;;  %v1803_v53 = vld [vmem:[#allocation2 + $0xb0] sm:$0xff]  ;;  %v1804_v18 = vld [vmem:[#allocation2 + $0xb8] sm:$0xff]  ;;  %2335 = vmatprep.mubr.msk.f32.mxu0 %vm1819_vm9, %v3543_v54 }
 0x1e0   : > { %807 = vst.msk [vmem:[#allocation2 + $0xc8] sm:$0xff] %vm781_vm3, %v736_v48  ;;  %806 = vst.msk [vmem:[#allocation2 + $0xc0] sm:$0xff] %vm781_vm3, %v734_v52  ;;  %v2355_v38 = vpack.c.bf16 %v1804_v18, %v1803_v53  ;;  %v1813_v48 = vld [vmem:[%s3675_s2] sm:$0xff]  ;;  %v2507_v52 = vmov 0  }
 0x1e1   : > { %1516 = vrot.lane.b32.xlu1 %v2229_v60, %s2505_s8  ;;  %1514 = vrot.lane.b32.xlu0 %v2228_v61, %s2505_s8 }
 0x1e2   : > { %2357 = vmatprep.subr.msk.bf16.mxu0 %vm3266_vm10, %v2355_v38  ;;  %2434 = vset.pattern.permute.xlu0 %v2507_v52 }
 0x1e3   : > { %v929_v47 = vpop.permute.xlu1 %928  ;;  %v927_v4 = vpop.permute.xlu0 %926  ;;  %v1787_v26 = vld [vmem:[#allocation2 + $0x30] sm:$0xff]  ;;  %v1788_v27 = vld [vmem:[#allocation2 + $0x38] sm:$0xff] }
 0x1e4   : > { %1000 = vst.msk [vmem:[#allocation2 + $0xc8] sm:$0xff] %vm974_vm4, %v929_v47  ;;  %999 = vst.msk [vmem:[#allocation2 + $0xc0] sm:$0xff] %vm974_vm4, %v927_v4  ;;  %v2358_v29 = vpack.c.bf16 %v1788_v27, %v1787_v26 }
 0x1e5   : > { %1484 = vrot.lane.b32.xlu1 %v2213_v39, %s2505_s8  ;;  %1482 = vrot.lane.b32.xlu0 %v2212_v46, %s2505_s8 }
 0x1e6   : > { %2360 = vmatpush3.bf16.xpose.msk.msra.mxu0 %vm3266_vm10, %v2358_v29 }
 0x1e7   : > { %v897_v14 = vpop.permute.xlu1 %896  ;;  %v895_v12 = vpop.permute.xlu0 %894 }
 0x1e8   : > { %984 = vst.msk [vmem:[#allocation2 + $0x48] sm:$0xff] %vm974_vm4, %v897_v14  ;;  %983 = vst.msk [vmem:[#allocation2 + $0x40] sm:$0xff] %vm974_vm4, %v895_v12 }
 0x1e9   : > { %1709 = vrot.lane.b32.xlu1 %v2261_v30, %s2506_s9  ;;  %1707 = vrot.lane.b32.xlu0 %v2260_v13, %s2506_s9 }
 0x1eb   : > { %v1122_v23 = vpop.permute.xlu1 %1121  ;;  %v1120_v33 = vpop.permute.xlu0 %1119 }
 0x1ec   : > { %1193 = vst.msk [vmem:[#allocation2 + $0xc8] sm:$0xff] %vm1167_vm5, %v1122_v23  ;;  %1192 = vst.msk [vmem:[#allocation2 + $0xc0] sm:$0xff] %vm1167_vm5, %v1120_v33 }
 0x1ed   : > { %1677 = vrot.lane.b32.xlu1 %v2245_v32, %s2506_s9  ;;  %1675 = vrot.lane.b32.xlu0 %v2244_v22, %s2506_s9 }
 0x1ef   : > { %v1090_v34 = vpop.permute.xlu1 %1089  ;;  %v1088_v35 = vpop.permute.xlu0 %1087 }
 0x1f0   : > { %1177 = vst.msk [vmem:[#allocation2 + $0x48] sm:$0xff] %vm1167_vm5, %v1090_v34  ;;  %1176 = vst.msk [vmem:[#allocation2 + $0x40] sm:$0xff] %vm1167_vm5, %v1088_v35 }
 0x1f1   : > { %747 = vrot.lane.b32.xlu1 %v2197_v63, %s2501_s4  ;;  %745 = vrot.lane.b32.xlu0 %v2196_v57, %s2501_s4  ;;  %v2262_v63 = vld [vmem:[%s2582_s28 + $0x19a] sm:$0xff]  ;;  %s1993_s4 = scalar_lea.sflag [#allocation4], %s161_s20 }
 0x1f3   : > { %v1316_v36 = vpop.permute.xlu1 %1315  ;;  %v1314_v37 = vpop.permute.xlu0 %1313 }
 0x1f4   : > { %1387 = vst.msk [vmem:[#allocation2 + $0xc8] sm:$0xff] %vm1361_vm6, %v1316_v36  ;;  %1386 = vst.msk [vmem:[#allocation2 + $0xc0] sm:$0xff] %vm1361_vm6, %v1314_v37 }
 0x1f5   : > { %940 = vrot.lane.b32.xlu1 %v2229_v60, %s2502_s5  ;;  %938 = vrot.lane.b32.xlu0 %v2228_v61, %s2502_s5 }
 0x1f7   : > { %v1284_v42 = vpop.permute.xlu1 %1283  ;;  %v1282_v43 = vpop.permute.xlu0 %1281 }
 0x1f8   : > { %1371 = vst.msk [vmem:[#allocation2 + $0x48] sm:$0xff] %vm1361_vm6, %v1284_v42  ;;  %1370 = vst.msk [vmem:[#allocation2 + $0x40] sm:$0xff] %vm1361_vm6, %v1282_v43 }
 0x1f9   : > { %908 = vrot.lane.b32.xlu1 %v2213_v39, %s2502_s5  ;;  %906 = vrot.lane.b32.xlu0 %v2212_v46, %s2502_s5  ;;  %s2508_s5 = smov [#allocation3]  }
 0x1fb   : > { %v1509_v62 = vpop.permute.xlu1 %1508  ;;  %v1507_v0 = vpop.permute.xlu0 %1506 }
 0x1fc   : > { %1580 = vst.msk [vmem:[#allocation2 + $0xc8] sm:$0xff] %vm1554_vm7, %v1509_v62  ;;  %1579 = vst.msk [vmem:[#allocation2 + $0xc0] sm:$0xff] %vm1554_vm7, %v1507_v0 }
 0x1fd   : > { %1133 = vrot.lane.b32.xlu1 %v2261_v30, %s2503_s6  ;;  %1131 = vrot.lane.b32.xlu0 %v2260_v13, %s2503_s6 }
 0x1ff   : > { %v1477_v40 = vpop.permute.xlu1 %1476  ;;  %v1475_v41 = vpop.permute.xlu0 %1474 }
 0x200   : > { %1564 = vst.msk [vmem:[#allocation2 + $0x48] sm:$0xff] %vm1554_vm7, %v1477_v40  ;;  %1563 = vst.msk [vmem:[#allocation2 + $0x40] sm:$0xff] %vm1554_vm7, %v1475_v41 }
 0x201   : > { %1101 = vrot.lane.b32.xlu1 %v2245_v32, %s2503_s6  ;;  %1099 = vrot.lane.b32.xlu0 %v2244_v22, %s2503_s6  ;;  %s2439_s6 = sshll.u32 %s2508_s5, 4  ;;  %s2440_s6 = int_to_ptr.vmem [resolvable:$false] %s2439_s6 }
 0x202   : > { %p2442_p0 = scmp.lt.s32.totalorder %s3633_s27, %s2440_s6 }
 0x203   : > { %v1702_v6 = vpop.permute.xlu1 %1701  ;;  %v1700_v7 = vpop.permute.xlu0 %1699 }
 0x204   : > { %1773 = vst.msk [vmem:[#allocation2 + $0xc8] sm:$0xff] %vm1747_vm8, %v1702_v6  ;;  %1772 = vst.msk [vmem:[#allocation2 + $0xc0] sm:$0xff] %vm1747_vm8, %v1700_v7 }
 0x205   : > { %1327 = vrot.lane.b32.xlu1 %v2199_v50, %s2504_s7  ;;  %1325 = vrot.lane.b32.xlu0 %v2198_v51, %s2504_s7 }
 0x207   : > { %v1670_v15 = vpop.permute.xlu1 %1669  ;;  %v1668_v17 = vpop.permute.xlu0 %1667 }
 0x208   : > { %1757 = vst.msk [vmem:[#allocation2 + $0x48] sm:$0xff] %vm1747_vm8, %v1670_v15  ;;  %1756 = vst.msk [vmem:[#allocation2 + $0x40] sm:$0xff] %vm1747_vm8, %v1668_v17 }
 0x209   : > { %1295 = vrot.lane.b32.xlu1 %v2183_v58, %s2504_s7  ;;  %1293 = vrot.lane.b32.xlu0 %v2182_v59, %s2504_s7  ;;  %s2441_s7 = scalar_lea.vmem %s2440_s6, 512 }
 0x20a   : > { %p2443_p1 = scmp.lt.s32.totalorder %s2441_s7, %s2435_s16 }
 0x20b   : > { %v740_v24 = vpop.permute.xlu1 %739  ;;  %v738_v25 = vpop.permute.xlu0 %737  ;;  %v1805_v3 = vld [vmem:[#allocation2 + $0xc0] sm:$0xff]  ;;  %v1806_v10 = vld [vmem:[#allocation2 + $0xc8] sm:$0xff] }
 0x20c   : > { %809 = vst.msk [vmem:[#allocation2 + $0xd8] sm:$0xff] %vm781_vm3, %v740_v24  ;;  %808 = vst.msk [vmem:[#allocation2 + $0xd0] sm:$0xff] %vm781_vm3, %v738_v25  ;;  %v2361_v8 = vpack.c.bf16 %v1806_v10, %v1805_v3  ;;  %p2444_p2 = por %p2443_p1, %p2442_p0 }
 0x20d   : > { %1520 = vrot.lane.b32.xlu1 %v2231_v2, %s2505_s8  ;;  %1518 = vrot.lane.b32.xlu0 %v2230_v1, %s2505_s8 }
 0x20e   : > { %2363 = vmatprep.subr.msk.bf16.mxu0 %vm3266_vm10, %v2361_v8  ;;  %p2445_p3 = pnand %p2444_p2, %p2438_p13 }
 0x20f   : > { %v933_v16 = vpop.permute.xlu1 %932  ;;  %v931_v21 = vpop.permute.xlu0 %930  ;;  %v1789_v28 = vld [vmem:[#allocation2 + $0x40] sm:$0xff]  ;;  %v1790_v31 = vld [vmem:[#allocation2 + $0x48] sm:$0xff] }
 0x210   : > { %1002 = vst.msk [vmem:[#allocation2 + $0xd8] sm:$0xff] %vm974_vm4, %v933_v16  ;;  %1001 = vst.msk [vmem:[#allocation2 + $0xd0] sm:$0xff] %vm974_vm4, %v931_v21  ;;  %v2364_v19 = vpack.c.bf16 %v1790_v31, %v1789_v28 }
 0x211   : > { %1488 = vrot.lane.b32.xlu1 %v2215_v9, %s2505_s8  ;;  %1486 = vrot.lane.b32.xlu0 %v2214_v11, %s2505_s8 }
 0x212   : > { %2366 = vmatpush3.bf16.xpose.msk.msra.mxu0 %vm3266_vm10, %v2364_v19 }
 0x213   : > { %v901_v57 = vpop.permute.xlu1 %900  ;;  %v899_v44 = vpop.permute.xlu0 %898 }
 0x214   : > { %986 = vst.msk [vmem:[#allocation2 + $0x58] sm:$0xff] %vm974_vm4, %v901_v57  ;;  %985 = vst.msk [vmem:[#allocation2 + $0x50] sm:$0xff] %vm974_vm4, %v899_v44 }
 0x215   : > { %1713 = vrot.lane.b32.xlu1 %v2263_v20, %s2506_s9  ;;  %1711 = vrot.lane.b32.xlu0 %v2262_v63, %s2506_s9 }
 0x217   : > { %v1126_v55 = vpop.permute.xlu1 %1125  ;;  %v1124_v49 = vpop.permute.xlu0 %1123 }
 0x218   : > { %1195 = vst.msk [vmem:[#allocation2 + $0xd8] sm:$0xff] %vm1167_vm5, %v1126_v55  ;;  %1194 = vst.msk [vmem:[#allocation2 + $0xd0] sm:$0xff] %vm1167_vm5, %v1124_v49 }
 0x219   : > { %1681 = vrot.lane.b32.xlu1 %v2247_v45, %s2506_s9  ;;  %1679 = vrot.lane.b32.xlu0 %v2246_v56, %s2506_s9 }
 0x21b   : > { %v1094_v60 = vpop.permute.xlu1 %1093  ;;  %v1092_v61 = vpop.permute.xlu0 %1091 }
 0x21c   : > { %1179 = vst.msk [vmem:[#allocation2 + $0x58] sm:$0xff] %vm1167_vm5, %v1094_v60  ;;  %1178 = vst.msk [vmem:[#allocation2 + $0x50] sm:$0xff] %vm1167_vm5, %v1092_v61 }
 0x21d   : > { %1816 = vperm.xlu0 %2434, %v1813_v48  }
 0x21f   : > { %v1320_v53 = vpop.permute.xlu1 %1319  ;;  %v1318_v18 = vpop.permute.xlu0 %1317 }
 0x220   : > { %1389 = vst.msk [vmem:[#allocation2 + $0xd8] sm:$0xff] %vm1361_vm6, %v1320_v53  ;;  %1388 = vst.msk [vmem:[#allocation2 + $0xd0] sm:$0xff] %vm1361_vm6, %v1318_v18 }
 0x223   : > { %v1288_v38 = vpop.permute.xlu1 %1287  ;;  %v1286_v39 = vpop.permute.xlu0 %1285 }
 0x224   : > { %1373 = vst.msk [vmem:[#allocation2 + $0x58] sm:$0xff] %vm1361_vm6, %v1288_v38  ;;  %1372 = vst.msk [vmem:[#allocation2 + $0x50] sm:$0xff] %vm1361_vm6, %v1286_v39 }
 0x227   : > { %v1513_v46 = vpop.permute.xlu1 %1512  ;;  %v1511_v47 = vpop.permute.xlu0 %1510 }
 0x228   : > { %1582 = vst.msk [vmem:[#allocation2 + $0xd8] sm:$0xff] %vm1554_vm7, %v1513_v46  ;;  %1581 = vst.msk [vmem:[#allocation2 + $0xd0] sm:$0xff] %vm1554_vm7, %v1511_v47 }
 0x22b   : > { %v1481_v4 = vpop.permute.xlu1 %1480  ;;  %v1479_v26 = vpop.permute.xlu0 %1478 }
 0x22c   : > { %1566 = vst.msk [vmem:[#allocation2 + $0x58] sm:$0xff] %vm1554_vm7, %v1481_v4  ;;  %1565 = vst.msk [vmem:[#allocation2 + $0x50] sm:$0xff] %vm1554_vm7, %v1479_v26 }
 0x22f   : > { %v1706_v27 = vpop.permute.xlu1 %1705  ;;  %v1704_v29 = vpop.permute.xlu0 %1703 }
 0x230   : > { %1775 = vst.msk [vmem:[#allocation2 + $0xd8] sm:$0xff] %vm1747_vm8, %v1706_v27  ;;  %1774 = vst.msk [vmem:[#allocation2 + $0xd0] sm:$0xff] %vm1747_vm8, %v1704_v29 }
 0x233   : > { %v1674_v30 = vpop.permute.xlu1 %1673  ;;  %v1672_v13 = vpop.permute.xlu0 %1671 }
 0x234   : > { %1759 = vst.msk [vmem:[#allocation2 + $0x58] sm:$0xff] %vm1747_vm8, %v1674_v30  ;;  %1758 = vst.msk [vmem:[#allocation2 + $0x50] sm:$0xff] %vm1747_vm8, %v1672_v13 }
 0x237   : > { %v744_v14 = vpop.permute.xlu1 %743  ;;  %v742_v12 = vpop.permute.xlu0 %741  ;;  %v1807_v32 = vld [vmem:[#allocation2 + $0xd0] sm:$0xff]  ;;  %v1808_v22 = vld [vmem:[#allocation2 + $0xd8] sm:$0xff] }
 0x238   : > { %811 = vst.msk [vmem:[#allocation2 + $0xe8] sm:$0xff] %vm781_vm3, %v744_v14  ;;  %810 = vst.msk [vmem:[#allocation2 + $0xe0] sm:$0xff] %vm781_vm3, %v742_v12  ;;  %v2367_v23 = vpack.c.bf16 %v1808_v22, %v1807_v32 }
 0x23a   : > { %2369 = vmatprep.subr.msk.bf16.mxu0 %vm3266_vm10, %v2367_v23 }
 0x23b   : > { %v937_v33 = vpop.permute.xlu1 %936  ;;  %v935_v34 = vpop.permute.xlu0 %934  ;;  %v1791_v35 = vld [vmem:[#allocation2 + $0x50] sm:$0xff]  ;;  %v1792_v36 = vld [vmem:[#allocation2 + $0x58] sm:$0xff] }
 0x23c   : > { %1004 = vst.msk [vmem:[#allocation2 + $0xe8] sm:$0xff] %vm974_vm4, %v937_v33  ;;  %1003 = vst.msk [vmem:[#allocation2 + $0xe0] sm:$0xff] %vm974_vm4, %v935_v34  ;;  %v2370_v37 = vpack.c.bf16 %v1792_v36, %v1791_v35 }
 0x23e   : > { %2372 = vmatpush3.bf16.xpose.msk.msra.mxu0 %vm3266_vm10, %v2370_v37 }
 0x23f   : > { %v905_v42 = vpop.permute.xlu1 %904  ;;  %v903_v43 = vpop.permute.xlu0 %902 }
 0x240   : > { %988 = vst.msk [vmem:[#allocation2 + $0x68] sm:$0xff] %vm974_vm4, %v905_v42  ;;  %987 = vst.msk [vmem:[#allocation2 + $0x60] sm:$0xff] %vm974_vm4, %v903_v43 }
 0x243   : > { %v1130_v62 = vpop.permute.xlu1 %1129  ;;  %v1128_v0 = vpop.permute.xlu0 %1127 }
 0x244   : > { %1197 = vst.msk [vmem:[#allocation2 + $0xe8] sm:$0xff] %vm1167_vm5, %v1130_v62  ;;  %1196 = vst.msk [vmem:[#allocation2 + $0xe0] sm:$0xff] %vm1167_vm5, %v1128_v0 }
 0x247   : > { %v1098_v40 = vpop.permute.xlu1 %1097  ;;  %v1096_v41 = vpop.permute.xlu0 %1095 }
 0x248   : > { %1181 = vst.msk [vmem:[#allocation2 + $0x68] sm:$0xff] %vm1167_vm5, %v1098_v40  ;;  %1180 = vst.msk [vmem:[#allocation2 + $0x60] sm:$0xff] %vm1167_vm5, %v1096_v41 }
 0x24b   : > { %v1324_v50 = vpop.permute.xlu1 %1323  ;;  %v1322_v51 = vpop.permute.xlu0 %1321 }
 0x24c   : > { %1391 = vst.msk [vmem:[#allocation2 + $0xe8] sm:$0xff] %vm1361_vm6, %v1324_v50  ;;  %1390 = vst.msk [vmem:[#allocation2 + $0xe0] sm:$0xff] %vm1361_vm6, %v1322_v51 }
 0x24f   : > { %v1292_v6 = vpop.permute.xlu1 %1291  ;;  %v1290_v7 = vpop.permute.xlu0 %1289 }
 0x250   : > { %1375 = vst.msk [vmem:[#allocation2 + $0x68] sm:$0xff] %vm1361_vm6, %v1292_v6  ;;  %1374 = vst.msk [vmem:[#allocation2 + $0x60] sm:$0xff] %vm1361_vm6, %v1290_v7 }
 0x253   : > { %v1517_v58 = vpop.permute.xlu1 %1516  ;;  %v1515_v59 = vpop.permute.xlu0 %1514 }
 0x254   : > { %1584 = vst.msk [vmem:[#allocation2 + $0xe8] sm:$0xff] %vm1554_vm7, %v1517_v58  ;;  %1583 = vst.msk [vmem:[#allocation2 + $0xe0] sm:$0xff] %vm1554_vm7, %v1515_v59 }
 0x257   : > { %v1485_v15 = vpop.permute.xlu1 %1484  ;;  %v1483_v17 = vpop.permute.xlu0 %1482 }
 0x258   : > { %1568 = vst.msk [vmem:[#allocation2 + $0x68] sm:$0xff] %vm1554_vm7, %v1485_v15  ;;  %1567 = vst.msk [vmem:[#allocation2 + $0x60] sm:$0xff] %vm1554_vm7, %v1483_v17 }
 0x25b   : > { %v1710_v2 = vpop.permute.xlu1 %1709  ;;  %v1708_v1 = vpop.permute.xlu0 %1707 }
 0x25c   : > { %1777 = vst.msk [vmem:[#allocation2 + $0xe8] sm:$0xff] %vm1747_vm8, %v1710_v2  ;;  %1776 = vst.msk [vmem:[#allocation2 + $0xe0] sm:$0xff] %vm1747_vm8, %v1708_v1 }
 0x25f   : > { %v1678_v24 = vpop.permute.xlu1 %1677  ;;  %v1676_v25 = vpop.permute.xlu0 %1675 }
 0x260   : > { %1761 = vst.msk [vmem:[#allocation2 + $0x68] sm:$0xff] %vm1747_vm8, %v1678_v24  ;;  %1760 = vst.msk [vmem:[#allocation2 + $0x60] sm:$0xff] %vm1747_vm8, %v1676_v25 }
 0x263   : > { %v748_v3 = vpop.permute.xlu1 %747  ;;  %v746_v10 = vpop.permute.xlu0 %745  ;;  %v1809_v8 = vld [vmem:[#allocation2 + $0xe0] sm:$0xff]  ;;  %v1810_v9 = vld [vmem:[#allocation2 + $0xe8] sm:$0xff] }
 0x264   : > { %813 = vst.msk [vmem:[#allocation2 + $0xf8] sm:$0xff] %vm781_vm3, %v748_v3  ;;  %812 = vst.msk [vmem:[#allocation2 + $0xf0] sm:$0xff] %vm781_vm3, %v746_v10  ;;  %v2373_v11 = vpack.c.bf16 %v1810_v9, %v1809_v8 }
 0x266   : > { %2375 = vmatprep.subr.msk.bf16.mxu0 %vm3266_vm10, %v2373_v11 }
 0x267   : > { %v941_v16 = vpop.permute.xlu1 %940  ;;  %v939_v21 = vpop.permute.xlu0 %938  ;;  %v1793_v28 = vld [vmem:[#allocation2 + $0x60] sm:$0xff]  ;;  %v1794_v31 = vld [vmem:[#allocation2 + $0x68] sm:$0xff] }
 0x268   : > { %1006 = vst.msk [vmem:[#allocation2 + $0xf8] sm:$0xff] %vm974_vm4, %v941_v16  ;;  %1005 = vst.msk [vmem:[#allocation2 + $0xf0] sm:$0xff] %vm974_vm4, %v939_v21  ;;  %v2376_v19 = vpack.c.bf16 %v1794_v31, %v1793_v28 }
 0x26a   : > { %2378 = vmatpush3.bf16.xpose.msk.msra.mxu0 %vm3266_vm10, %v2376_v19 }
 0x26b   : > { %v909_v20 = vpop.permute.xlu1 %908  ;;  %v907_v63 = vpop.permute.xlu0 %906 }
 0x26c   : > { %990 = vst.msk [vmem:[#allocation2 + $0x78] sm:$0xff] %vm974_vm4, %v909_v20  ;;  %989 = vst.msk [vmem:[#allocation2 + $0x70] sm:$0xff] %vm974_vm4, %v907_v63 }
 0x26f   : > { %v1134_v57 = vpop.permute.xlu1 %1133  ;;  %v1132_v44 = vpop.permute.xlu0 %1131 }
 0x270   : > { %1199 = vst.msk [vmem:[#allocation2 + $0xf8] sm:$0xff] %vm1167_vm5, %v1134_v57  ;;  %1198 = vst.msk [vmem:[#allocation2 + $0xf0] sm:$0xff] %vm1167_vm5, %v1132_v44 }
 0x273   : > { %v1102_v45 = vpop.permute.xlu1 %1101  ;;  %v1100_v56 = vpop.permute.xlu0 %1099 }
 0x274   : > { %1183 = vst.msk [vmem:[#allocation2 + $0x78] sm:$0xff] %vm1167_vm5, %v1102_v45  ;;  %1182 = vst.msk [vmem:[#allocation2 + $0x70] sm:$0xff] %vm1167_vm5, %v1100_v56 }
 0x277   : > { %v1328_v55 = vpop.permute.xlu1 %1327  ;;  %v1326_v49 = vpop.permute.xlu0 %1325 }
 0x278   : > { %1393 = vst.msk [vmem:[#allocation2 + $0xf8] sm:$0xff] %vm1361_vm6, %v1328_v55  ;;  %1392 = vst.msk [vmem:[#allocation2 + $0xf0] sm:$0xff] %vm1361_vm6, %v1326_v49 }
 0x27b   : > { %v1296_v60 = vpop.permute.xlu1 %1295  ;;  %v1294_v61 = vpop.permute.xlu0 %1293 }
 0x27c   : > { %1377 = vst.msk [vmem:[#allocation2 + $0x78] sm:$0xff] %vm1361_vm6, %v1296_v60  ;;  %1376 = vst.msk [vmem:[#allocation2 + $0x70] sm:$0xff] %vm1361_vm6, %v1294_v61 }
 0x27f   : > { %v1521_v48 = vpop.permute.xlu1 %1520  ;;  %v1519_v52 = vpop.permute.xlu0 %1518 }
 0x280   : > { %1586 = vst.msk [vmem:[#allocation2 + $0xf8] sm:$0xff] %vm1554_vm7, %v1521_v48  ;;  %1585 = vst.msk [vmem:[#allocation2 + $0xf0] sm:$0xff] %vm1554_vm7, %v1519_v52 }
 0x283   : > { %v1489_v53 = vpop.permute.xlu1 %1488  ;;  %v1487_v18 = vpop.permute.xlu0 %1486 }
 0x284   : > { %1570 = vst.msk [vmem:[#allocation2 + $0x78] sm:$0xff] %vm1554_vm7, %v1489_v53  ;;  %1569 = vst.msk [vmem:[#allocation2 + $0x70] sm:$0xff] %vm1554_vm7, %v1487_v18 }
 0x287   : > { %v1714_v38 = vpop.permute.xlu1 %1713  ;;  %v1712_v39 = vpop.permute.xlu0 %1711 }
 0x288   : > { %1779 = vst.msk [vmem:[#allocation2 + $0xf8] sm:$0xff] %vm1747_vm8, %v1714_v38  ;;  %1778 = vst.msk [vmem:[#allocation2 + $0xf0] sm:$0xff] %vm1747_vm8, %v1712_v39 }
 0x28b   : > { %v1682_v46 = vpop.permute.xlu1 %1681  ;;  %v1680_v47 = vpop.permute.xlu0 %1679 }
 0x28c   : > { %1763 = vst.msk [vmem:[#allocation2 + $0x78] sm:$0xff] %vm1747_vm8, %v1682_v46  ;;  %1762 = vst.msk [vmem:[#allocation2 + $0x70] sm:$0xff] %vm1747_vm8, %v1680_v47 }
 0x28f   : > { %v1811_v4 = vld [vmem:[#allocation2 + $0xf0] sm:$0xff]  ;;  %v1812_v26 = vld [vmem:[#allocation2 + $0xf8] sm:$0xff] }
 0x290   : > { %v2379_v27 = vpack.c.bf16 %v1812_v26, %v1811_v4 }
 0x292   : > { %2381 = vmatprep.subr.msk.bf16.mxu0 %vm3266_vm10, %v2379_v27 }
 0x293   : > { %v1795_v29 = vld [vmem:[#allocation2 + $0x70] sm:$0xff]  ;;  %v1796_v30 = vld [vmem:[#allocation2 + $0x78] sm:$0xff] }
 0x294   : > { %v2382_v13 = vpack.c.bf16 %v1796_v30, %v1795_v29 }
 0x296   : > { %2384 = vmatpush3.bf16.xpose.msk.msra.mxu0 %vm3266_vm10, %v2382_v13 }
 0x29c   : > { %v1817_v14 = vpop.permute.xlu0 %1816 }
 0x29d   : > { %2336 = vmatmul.mubr.msk.f32.vlgmr.msra.gmra.mrb[0].mxu0 %vm1819_vm9, %v3543_v54 }
 0x370   : > { %v1985_v12 = vpop.f32.mrb[0].mxu0 }
 0x371   : > { %v1986_v32 = vadd.f32 %v1985_v12, %v1817_v14  ;;  %v1987_v22 = vpop.f32.mrb[1].mxu0 }
 0x372   : > { %v1988_v23 = vadd.f32 %v1987_v22, %v1817_v14 }
 0x373   : > { %1990 = vst [vmem:[%s163_s26] sm:$0xff] %v1986_v32 }
 0x374   : > { %1991 = vst [vmem:[%s163_s26 + $0x8] sm:$0xff] %v1988_v23 }
 0x375   : > { %2448 = shalt.err (!%p2445_p3)
}
 0x376   : > { %s2449_s8 = scalar_lea.hbm %s3631_s30, 256  ;;  %s2453_s11 = scalar_lea.hbm %s3676_s3, 512 }
 0x377   : > { %p2450_p4 = scmp.ne.s32.totalorder %s3631_s30, %s2449_s8  ;;  %p2454_p9 = scmp.lt.u32.totalorder %s3631_s30, %s3676_s3 }
 0x378   : > { %p2455_p10 = scmp.lt.u32.totalorder %s2453_s11, %s2449_s8  ;;  %p2457_p12 = scmp.lt.u32.totalorder %s2449_s8, %s3631_s30 }
 0x379   : > { %p2451_p7 = pnand %p2450_p4, %p2567_p5 }
 0x37a   : > { %p2456_p11 = por %p2455_p10, %p2454_p9 }
 0x37b   : > { %p2452_p8 = pneg %p2451_p7 }
 0x37c   : > { %p2458_p13 = por %p2457_p12, %p2456_p11 }
 0x37e   : > { %p2459_p0 = pnand %p2458_p13, %p2452_p8 }
 0x380   : > { %2462 = shalt.err (!%p2459_p0)
}
 0x381   : > { %2386 = dma.vmem_to_hbm [thread:$0]  (%p2567_p5), %s3633_s27, 256, %s3631_s30, %s1993_s4  }
 0x382 PF: > { %p2392_p1 = scmp.ge.s32.totalorder %s2497_s15, 2  ;;  %s2019_s20 = sand.u32 1, %s2485_s12  }
 0x383   : > { %s2020_s24 = scalar_lea.sflag [#allocation4], %s2019_s20 }
 0x384   : > { %p2389_p2 = pnand %p2392_p1, %p2571_p6 }
 0x386   : > { %2480 = dma.done.wait (!%p2389_p2), %s2020_s24, 256  }
 0x387   : > { %2482 = vsyncadd (!%p2389_p2), %s2020_s24, 4294967040  ;;  %p13_p3 = scmp.ge.s32.totalorder %s2554_s18, 4   ;;  %s3714_s12 = smov %s2489_s13 }
 0x388   : > { %s3715_s13 = smov %s2493_s14  ;;  %s3716_s14 = smov %s2565_s21 }
 0x389   : > { %s3717_s15 = smov %s2554_s18  ;;  %15 = sbr.rel (!%p13_p3) target bundleno = 3 (0x3), region = 69 }
 0x390   :  { %2025 = vsyncpa [#allocation4], 1 }
 0x391   :  { %2027 = vsyncpa [#allocation4 + $0x1], 1 }

</bundles_post_ra>
